<compile_context>
chip_gen: v5e
topology: v5e:2x2
jax: 0.10.0
libtpu: 0.0.40
codegen_flags: <defaults>
</compile_context>

<pallas_src>
import math

import jax
import jax.numpy as jnp
from jax import lax
from jax.experimental import pallas as pl
from jax.experimental.pallas import tpu as pltpu

BN_EPS = 1e-5
NEG_SLOPE = 0.2


def _encoder_kernel(idx_ref, off_ref, m_ref, b1_ref, w2_ref, b2_ref, out_ref):
    b = idx_ref.shape[0]           # batch
    p = idx_ref.shape[1]           # positions = 4 * H * W
    r = m_ref.shape[0] // p        # combined embedding-table rows (24)

    # Combined-table row index per (channel, cell) position.
    g = idx_ref[...] + off_ref[...]                         # (B, P) int32

    # One-hot over table rows, columns laid out as j = t*P + p to match M.
    onehot = jnp.concatenate(
        [(g == t).astype(jnp.bfloat16) for t in range(r)], axis=1)  # (B, R*P)

    # Fused embedding gather + fc1 on the MXU (bf16 inputs, f32 accumulation).
    h = jnp.dot(onehot, m_ref[...], preferred_element_type=jnp.float32)
    h = h + b1_ref[...]
    h = jnp.where(h > 0, h, NEG_SLOPE * h)                  # LeakyReLU(0.2)

    # BatchNorm1d, training mode (batch stats, biased variance), one pass.
    inv_b = 1.0 / b
    s1 = jnp.sum(h, axis=0, keepdims=True)
    s2 = jnp.sum(h * h, axis=0, keepdims=True)
    mean = s1 * inv_b
    var = s2 * inv_b - mean * mean
    h = (h - mean) * lax.rsqrt(var + BN_EPS)                # gamma/beta folded into fc2

    # fc2 (BN affine pre-folded; columns zero-padded to a 128-lane multiple).
    o = jnp.dot(h, w2_ref[...], preferred_element_type=jnp.float32)
    o = o + b2_ref[...]
    out_ref[...] = jnp.where(o > 0, o, NEG_SLOPE * o)       # LeakyReLU(0.2)


def init_params(key, input_size, d_hidden, d_out, emb_dim=8,
                num_objects=11, num_colors=6, num_states=3,
                num_orientations=4):
    """PyTorch-equivalent parameter init (master copies in f32)."""
    d_in = int(math.prod(input_size)) * emb_dim
    ks = jax.random.split(key, 8)
    # nn.Embedding default init: N(0, 1)
    obj_emb = jax.random.normal(ks[0], (num_objects, emb_dim), jnp.float32)
    col_emb = jax.random.normal(ks[1], (num_colors, emb_dim), jnp.float32)
    sta_emb = jax.random.normal(ks[2], (num_states, emb_dim), jnp.float32)
    ori_emb = jax.random.normal(ks[3], (num_orientations, emb_dim), jnp.float32)
    # nn.Linear default init, stored transposed to (in, out).
    lim1 = 1.0 / math.sqrt(d_in)
    w1 = jax.random.uniform(ks[4], (d_in, d_hidden), jnp.float32, -lim1, lim1)
    b1 = jax.random.uniform(ks[5], (1, d_hidden), jnp.float32, -lim1, lim1)
    lim2 = 1.0 / math.sqrt(d_hidden)
    w2 = jax.random.uniform(ks[6], (d_hidden, d_out), jnp.float32, -lim2, lim2)
    b2 = jax.random.uniform(ks[7], (1, d_out), jnp.float32, -lim2, lim2)
    gamma = jnp.ones((1, d_hidden), jnp.float32)   # BatchNorm1d affine
    beta = jnp.zeros((1, d_hidden), jnp.float32)
    return dict(obj_emb=obj_emb, col_emb=col_emb, sta_emb=sta_emb,
                ori_emb=ori_emb, w1=w1, b1=b1, gamma=gamma, beta=beta,
                w2=w2, b2=b2)


def prepare_params(params, input_size, emb_dim=8):
    """One-time prep: fuse embeddings into fc1, fold BN affine into fc2."""
    n_ch, height, width = input_size            # (4, H, W)
    p = n_ch * height * width
    e_dim = emb_dim
    d_hidden = params["w1"].shape[1]

    # Combined embedding table; rows ordered [objects, colors, states, orient]
    # to match the channel order of x.
    tables = [params["obj_emb"], params["col_emb"],
              params["sta_emb"], params["ori_emb"]]
    t_comb = jnp.concatenate(tables, axis=0)                         # (R, E)
    sizes = [int(t.shape[0]) for t in tables]
    ch_off = jnp.array([0, sizes[0], sizes[0] + sizes[1],
                        sizes[0] + sizes[1] + sizes[2]], jnp.int32)
    off = jnp.repeat(ch_off, height * width).reshape(1, p)           # (1, P)

    # Permute fc1 rows from PyTorch's stack(-1)+flatten order
    #   row = ((y*W + x)*E + e)*4 + s,  s in [colors, objects, states, orient]
    # to the kernel's (channel, y, x, e) order (channel = x-plane order).
    w1 = params["w1"].reshape(height, width, e_dim, n_ch, d_hidden)
    w1 = jnp.transpose(w1, (3, 0, 1, 2, 4))                          # (s, y, x, e, D)
    w1 = w1[jnp.array([1, 0, 2, 3])]                                 # channel -> stack slot
    w1 = w1.reshape(p, e_dim, d_hidden)

    # Fuse the table with fc1:  M[t*P + p, d] = sum_e T[t, e] * W1[p, e, d]
    m = jnp.einsum("te,ped->tpd", t_comb, w1,
                   precision=jax.lax.Precision.HIGHEST)
    m = m.reshape(-1, d_hidden).astype(jnp.bfloat16)                 # (R*P, D) bf16

    # Fold BatchNorm affine into fc2 (exact) and pad to a lane multiple.
    w2 = params["gamma"].reshape(-1, 1) * params["w2"]               # (D, d_out)
    b2 = params["beta"] @ params["w2"] + params["b2"]                # (1, d_out)
    d_out = int(w2.shape[1])
    d_pad = ((d_out + 127) // 128) * 128
    w2 = jnp.pad(w2, ((0, 0), (0, d_pad - d_out)))
    b2 = jnp.pad(b2, ((0, 0), (0, d_pad - d_out)))

    return dict(off=off, m=m, b1=params["b1"], w2=w2, b2=b2, d_out=d_out)


def minigrid_encoder_forward(x, prep):
    """x: (B, 4, H, W) integer index planes [object, color, state, orientation]."""
    b = x.shape[0]
    idx = x.astype(jnp.int32).reshape(b, -1)      # (B, 4*H*W); contiguous reshape
    d_pad = prep["w2"].shape[1]
    vmem = pl.BlockSpec(memory_space=pltpu.MemorySpace.VMEM)
    out = pl.pallas_call(
        _encoder_kernel,
        out_shape=jax.ShapeDtypeStruct((b, d_pad), jnp.float32),
        in_specs=[vmem] * 6,
        out_specs=vmem,
    )(idx, prep["off"], prep["m"], prep["b1"], prep["w2"], prep["b2"])
    return out[:, :prep["d_out"]]


def _reference_forward(x, params):
    """Pure-JAX f32 reference with exact PyTorch-module semantics."""
    x = x.astype(jnp.int32)
    objects = params["obj_emb"][x[:, 0]]
    colors = params["col_emb"][x[:, 1]]
    states = params["sta_emb"][x[:, 2]]
    orient = params["ori_emb"][x[:, 3]]
    emb = jnp.stack([colors, objects, states, orient], axis=-1)
    emb = emb.reshape(x.shape[0], -1).astype(jnp.float32)
    h = jnp.dot(emb, params["w1"], precision=jax.lax.Precision.HIGHEST)
    h = h + params["b1"]
    h = jnp.where(h > 0, h, NEG_SLOPE * h)
    mean = jnp.mean(h, axis=0, keepdims=True)
    var = jnp.mean(jnp.square(h - mean), axis=0, keepdims=True)
    h = (h - mean) / jnp.sqrt(var + BN_EPS) * params["gamma"] + params["beta"]
    o = jnp.dot(h, params["w2"], precision=jax.lax.Precision.HIGHEST)
    o = o + params["b2"]
    return jnp.where(o > 0, o, NEG_SLOPE * o)


if __name__ == "__main__":
    B, H, W = 4, 8, 8
    EMB_DIM = 8
    D_HIDDEN, D_OUT = 128, 64
    NUM_OBJECTS, NUM_COLORS, NUM_STATES, NUM_ORIENT = 11, 6, 3, 4
    input_size = (4, H, W)           # np.prod(input_size) * emb_dim = fc1 fan-in

    key = jax.random.PRNGKey(0)
    k_params, k0, k1, k2, k3 = jax.random.split(key, 5)
    params = init_params(k_params, input_size, D_HIDDEN, D_OUT, emb_dim=EMB_DIM,
                         num_objects=NUM_OBJECTS, num_colors=NUM_COLORS,
                         num_states=NUM_STATES, num_orientations=NUM_ORIENT)
    prep = prepare_params(params, input_size, emb_dim=EMB_DIM)

    # Deterministic integer input grid: (B, 4, H, W) with valid index ranges.
    x = jnp.stack([
        jax.random.randint(k0, (B, H, W), 0, NUM_OBJECTS),
        jax.random.randint(k1, (B, H, W), 0, NUM_COLORS),
        jax.random.randint(k2, (B, H, W), 0, NUM_STATES),
        jax.random.randint(k3, (B, H, W), 0, NUM_ORIENT),
    ], axis=1).astype(jnp.int32)

    out = jax.block_until_ready(minigrid_encoder_forward(x, prep))
    ref = jax.block_until_ready(_reference_forward(x, params))
    assert out.shape == (B, D_OUT)
    # bf16 fc1 weights -> compare against the f32 reference at bf16-level tolerance.
    max_diff = float(jnp.max(jnp.abs(out - ref)))
    assert jnp.allclose(out, ref, atol=2e-2, rtol=2e-2), max_diff
    print("KERNEL_OK")
</pallas_src>

<mosaic_0001>
module attributes {stable_mosaic.version = 11 : i64} {
  func.func @_encoder_kernel(%arg0: memref<4x256xi32, #tpu.memory_space<vmem>>, %arg1: memref<1x256xi32, #tpu.memory_space<vmem>>, %arg2: memref<6144x128xbf16, #tpu.memory_space<vmem>>, %arg3: memref<1x128xf32, #tpu.memory_space<vmem>>, %arg4: memref<128x128xf32, #tpu.memory_space<vmem>>, %arg5: memref<1x128xf32, #tpu.memory_space<vmem>>, %arg6: memref<4x128xf32, #tpu.memory_space<vmem>>) attributes {dimension_semantics = [], scalar_prefetch = 0 : i64, scratch_operands = 0 : i64, tpu.core_type = #tpu.core_type<tc>} {
    %c0 = arith.constant 0 : index
    %c0_0 = arith.constant 0 : index
    %0 = vector.load %arg0[%c0, %c0_0] : memref<4x256xi32, #tpu.memory_space<vmem>>, vector<4x256xi32>
    %c0_1 = arith.constant 0 : index
    %c0_2 = arith.constant 0 : index
    %1 = vector.load %arg1[%c0_1, %c0_2] : memref<1x256xi32, #tpu.memory_space<vmem>>, vector<1x256xi32>
    %2 = vector.broadcast %1 : vector<1x256xi32> to vector<4x256xi32>
    %3 = arith.addi %0, %2 : vector<4x256xi32>
    %c0_i32 = arith.constant 0 : i32
    %4 = vector.broadcast %c0_i32 : i32 to vector<4x256xi32>
    %5 = arith.cmpi eq, %3, %4 : vector<4x256xi32>
    %6 = arith.extui %5 : vector<4x256xi1> to vector<4x256xi32>
    %7 = arith.sitofp %6 : vector<4x256xi32> to vector<4x256xf32>
    %8 = arith.truncf %7 : vector<4x256xf32> to vector<4x256xbf16>
    %c1_i32 = arith.constant 1 : i32
    %9 = vector.broadcast %c1_i32 : i32 to vector<4x256xi32>
    %10 = arith.cmpi eq, %3, %9 : vector<4x256xi32>
    %11 = arith.extui %10 : vector<4x256xi1> to vector<4x256xi32>
    %12 = arith.sitofp %11 : vector<4x256xi32> to vector<4x256xf32>
    %13 = arith.truncf %12 : vector<4x256xf32> to vector<4x256xbf16>
    %c2_i32 = arith.constant 2 : i32
    %14 = vector.broadcast %c2_i32 : i32 to vector<4x256xi32>
    %15 = arith.cmpi eq, %3, %14 : vector<4x256xi32>
    %16 = arith.extui %15 : vector<4x256xi1> to vector<4x256xi32>
    %17 = arith.sitofp %16 : vector<4x256xi32> to vector<4x256xf32>
    %18 = arith.truncf %17 : vector<4x256xf32> to vector<4x256xbf16>
    %c3_i32 = arith.constant 3 : i32
    %19 = vector.broadcast %c3_i32 : i32 to vector<4x256xi32>
    %20 = arith.cmpi eq, %3, %19 : vector<4x256xi32>
    %21 = arith.extui %20 : vector<4x256xi1> to vector<4x256xi32>
    %22 = arith.sitofp %21 : vector<4x256xi32> to vector<4x256xf32>
    %23 = arith.truncf %22 : vector<4x256xf32> to vector<4x256xbf16>
    %c4_i32 = arith.constant 4 : i32
    %24 = vector.broadcast %c4_i32 : i32 to vector<4x256xi32>
    %25 = arith.cmpi eq, %3, %24 : vector<4x256xi32>
    %26 = arith.extui %25 : vector<4x256xi1> to vector<4x256xi32>
    %27 = arith.sitofp %26 : vector<4x256xi32> to vector<4x256xf32>
    %28 = arith.truncf %27 : vector<4x256xf32> to vector<4x256xbf16>
    %c5_i32 = arith.constant 5 : i32
    %29 = vector.broadcast %c5_i32 : i32 to vector<4x256xi32>
    %30 = arith.cmpi eq, %3, %29 : vector<4x256xi32>
    %31 = arith.extui %30 : vector<4x256xi1> to vector<4x256xi32>
    %32 = arith.sitofp %31 : vector<4x256xi32> to vector<4x256xf32>
    %33 = arith.truncf %32 : vector<4x256xf32> to vector<4x256xbf16>
    %c6_i32 = arith.constant 6 : i32
    %34 = vector.broadcast %c6_i32 : i32 to vector<4x256xi32>
    %35 = arith.cmpi eq, %3, %34 : vector<4x256xi32>
    %36 = arith.extui %35 : vector<4x256xi1> to vector<4x256xi32>
    %37 = arith.sitofp %36 : vector<4x256xi32> to vector<4x256xf32>
    %38 = arith.truncf %37 : vector<4x256xf32> to vector<4x256xbf16>
    %c7_i32 = arith.constant 7 : i32
    %39 = vector.broadcast %c7_i32 : i32 to vector<4x256xi32>
    %40 = arith.cmpi eq, %3, %39 : vector<4x256xi32>
    %41 = arith.extui %40 : vector<4x256xi1> to vector<4x256xi32>
    %42 = arith.sitofp %41 : vector<4x256xi32> to vector<4x256xf32>
    %43 = arith.truncf %42 : vector<4x256xf32> to vector<4x256xbf16>
    %c8_i32 = arith.constant 8 : i32
    %44 = vector.broadcast %c8_i32 : i32 to vector<4x256xi32>
    %45 = arith.cmpi eq, %3, %44 : vector<4x256xi32>
    %46 = arith.extui %45 : vector<4x256xi1> to vector<4x256xi32>
    %47 = arith.sitofp %46 : vector<4x256xi32> to vector<4x256xf32>
    %48 = arith.truncf %47 : vector<4x256xf32> to vector<4x256xbf16>
    %c9_i32 = arith.constant 9 : i32
    %49 = vector.broadcast %c9_i32 : i32 to vector<4x256xi32>
    %50 = arith.cmpi eq, %3, %49 : vector<4x256xi32>
    %51 = arith.extui %50 : vector<4x256xi1> to vector<4x256xi32>
    %52 = arith.sitofp %51 : vector<4x256xi32> to vector<4x256xf32>
    %53 = arith.truncf %52 : vector<4x256xf32> to vector<4x256xbf16>
    %c10_i32 = arith.constant 10 : i32
    %54 = vector.broadcast %c10_i32 : i32 to vector<4x256xi32>
    %55 = arith.cmpi eq, %3, %54 : vector<4x256xi32>
    %56 = arith.extui %55 : vector<4x256xi1> to vector<4x256xi32>
    %57 = arith.sitofp %56 : vector<4x256xi32> to vector<4x256xf32>
    %58 = arith.truncf %57 : vector<4x256xf32> to vector<4x256xbf16>
    %c11_i32 = arith.constant 11 : i32
    %59 = vector.broadcast %c11_i32 : i32 to vector<4x256xi32>
    %60 = arith.cmpi eq, %3, %59 : vector<4x256xi32>
    %61 = arith.extui %60 : vector<4x256xi1> to vector<4x256xi32>
    %62 = arith.sitofp %61 : vector<4x256xi32> to vector<4x256xf32>
    %63 = arith.truncf %62 : vector<4x256xf32> to vector<4x256xbf16>
    %c12_i32 = arith.constant 12 : i32
    %64 = vector.broadcast %c12_i32 : i32 to vector<4x256xi32>
    %65 = arith.cmpi eq, %3, %64 : vector<4x256xi32>
    %66 = arith.extui %65 : vector<4x256xi1> to vector<4x256xi32>
    %67 = arith.sitofp %66 : vector<4x256xi32> to vector<4x256xf32>
    %68 = arith.truncf %67 : vector<4x256xf32> to vector<4x256xbf16>
    %c13_i32 = arith.constant 13 : i32
    %69 = vector.broadcast %c13_i32 : i32 to vector<4x256xi32>
    %70 = arith.cmpi eq, %3, %69 : vector<4x256xi32>
    %71 = arith.extui %70 : vector<4x256xi1> to vector<4x256xi32>
    %72 = arith.sitofp %71 : vector<4x256xi32> to vector<4x256xf32>
    %73 = arith.truncf %72 : vector<4x256xf32> to vector<4x256xbf16>
    %c14_i32 = arith.constant 14 : i32
    %74 = vector.broadcast %c14_i32 : i32 to vector<4x256xi32>
    %75 = arith.cmpi eq, %3, %74 : vector<4x256xi32>
    %76 = arith.extui %75 : vector<4x256xi1> to vector<4x256xi32>
    %77 = arith.sitofp %76 : vector<4x256xi32> to vector<4x256xf32>
    %78 = arith.truncf %77 : vector<4x256xf32> to vector<4x256xbf16>
    %c15_i32 = arith.constant 15 : i32
    %79 = vector.broadcast %c15_i32 : i32 to vector<4x256xi32>
    %80 = arith.cmpi eq, %3, %79 : vector<4x256xi32>
    %81 = arith.extui %80 : vector<4x256xi1> to vector<4x256xi32>
    %82 = arith.sitofp %81 : vector<4x256xi32> to vector<4x256xf32>
    %83 = arith.truncf %82 : vector<4x256xf32> to vector<4x256xbf16>
    %c16_i32 = arith.constant 16 : i32
    %84 = vector.broadcast %c16_i32 : i32 to vector<4x256xi32>
    %85 = arith.cmpi eq, %3, %84 : vector<4x256xi32>
    %86 = arith.extui %85 : vector<4x256xi1> to vector<4x256xi32>
    %87 = arith.sitofp %86 : vector<4x256xi32> to vector<4x256xf32>
    %88 = arith.truncf %87 : vector<4x256xf32> to vector<4x256xbf16>
    %c17_i32 = arith.constant 17 : i32
    %89 = vector.broadcast %c17_i32 : i32 to vector<4x256xi32>
    %90 = arith.cmpi eq, %3, %89 : vector<4x256xi32>
    %91 = arith.extui %90 : vector<4x256xi1> to vector<4x256xi32>
    %92 = arith.sitofp %91 : vector<4x256xi32> to vector<4x256xf32>
    %93 = arith.truncf %92 : vector<4x256xf32> to vector<4x256xbf16>
    %c18_i32 = arith.constant 18 : i32
    %94 = vector.broadcast %c18_i32 : i32 to vector<4x256xi32>
    %95 = arith.cmpi eq, %3, %94 : vector<4x256xi32>
    %96 = arith.extui %95 : vector<4x256xi1> to vector<4x256xi32>
    %97 = arith.sitofp %96 : vector<4x256xi32> to vector<4x256xf32>
    %98 = arith.truncf %97 : vector<4x256xf32> to vector<4x256xbf16>
    %c19_i32 = arith.constant 19 : i32
    %99 = vector.broadcast %c19_i32 : i32 to vector<4x256xi32>
    %100 = arith.cmpi eq, %3, %99 : vector<4x256xi32>
    %101 = arith.extui %100 : vector<4x256xi1> to vector<4x256xi32>
    %102 = arith.sitofp %101 : vector<4x256xi32> to vector<4x256xf32>
    %103 = arith.truncf %102 : vector<4x256xf32> to vector<4x256xbf16>
    %c20_i32 = arith.constant 20 : i32
    %104 = vector.broadcast %c20_i32 : i32 to vector<4x256xi32>
    %105 = arith.cmpi eq, %3, %104 : vector<4x256xi32>
    %106 = arith.extui %105 : vector<4x256xi1> to vector<4x256xi32>
    %107 = arith.sitofp %106 : vector<4x256xi32> to vector<4x256xf32>
    %108 = arith.truncf %107 : vector<4x256xf32> to vector<4x256xbf16>
    %c21_i32 = arith.constant 21 : i32
    %109 = vector.broadcast %c21_i32 : i32 to vector<4x256xi32>
    %110 = arith.cmpi eq, %3, %109 : vector<4x256xi32>
    %111 = arith.extui %110 : vector<4x256xi1> to vector<4x256xi32>
    %112 = arith.sitofp %111 : vector<4x256xi32> to vector<4x256xf32>
    %113 = arith.truncf %112 : vector<4x256xf32> to vector<4x256xbf16>
    %c22_i32 = arith.constant 22 : i32
    %114 = vector.broadcast %c22_i32 : i32 to vector<4x256xi32>
    %115 = arith.cmpi eq, %3, %114 : vector<4x256xi32>
    %116 = arith.extui %115 : vector<4x256xi1> to vector<4x256xi32>
    %117 = arith.sitofp %116 : vector<4x256xi32> to vector<4x256xf32>
    %118 = arith.truncf %117 : vector<4x256xf32> to vector<4x256xbf16>
    %c23_i32 = arith.constant 23 : i32
    %119 = vector.broadcast %c23_i32 : i32 to vector<4x256xi32>
    %120 = arith.cmpi eq, %3, %119 : vector<4x256xi32>
    %121 = arith.extui %120 : vector<4x256xi1> to vector<4x256xi32>
    %122 = arith.sitofp %121 : vector<4x256xi32> to vector<4x256xf32>
    %123 = arith.truncf %122 : vector<4x256xf32> to vector<4x256xbf16>
    %124 = tpu.concatenate %8, %13, %18, %23, %28, %33, %38, %43, %48, %53, %58, %63, %68, %73, %78, %83 in 1 : vector<4x256xbf16>, vector<4x256xbf16>, vector<4x256xbf16>, vector<4x256xbf16>, vector<4x256xbf16>, vector<4x256xbf16>, vector<4x256xbf16>, vector<4x256xbf16>, vector<4x256xbf16>, vector<4x256xbf16>, vector<4x256xbf16>, vector<4x256xbf16>, vector<4x256xbf16>, vector<4x256xbf16>, vector<4x256xbf16>, vector<4x256xbf16> -> vector<4x4096xbf16>
    %125 = tpu.concatenate %88, %93, %98, %103, %108, %113, %118, %123 in 1 : vector<4x256xbf16>, vector<4x256xbf16>, vector<4x256xbf16>, vector<4x256xbf16>, vector<4x256xbf16>, vector<4x256xbf16>, vector<4x256xbf16>, vector<4x256xbf16> -> vector<4x2048xbf16>
    %126 = tpu.concatenate %124, %125 in 1 : vector<4x4096xbf16>, vector<4x2048xbf16> -> vector<4x6144xbf16>
    %c0_3 = arith.constant 0 : index
    %c0_4 = arith.constant 0 : index
    %127 = vector.load %arg2[%c0_3, %c0_4] : memref<6144x128xbf16, #tpu.memory_space<vmem>>, vector<6144x128xbf16>
    %cst = arith.constant dense<0.000000e+00> : vector<4x128xf32>
    %128 = tpu.matmul %126, %127, %cst {dimension_numbers = #tpu.dot_dimension_numbers<[1], [0], [0], [1], [0, 0, 1, 1], [], []>} : vector<4x6144xbf16>, vector<6144x128xbf16>, vector<4x128xf32> -> vector<4x128xf32>
    %c0_5 = arith.constant 0 : index
    %c0_6 = arith.constant 0 : index
    %129 = vector.load %arg3[%c0_5, %c0_6] : memref<1x128xf32, #tpu.memory_space<vmem>>, vector<1x128xf32>
    %130 = vector.broadcast %129 : vector<1x128xf32> to vector<4x128xf32>
    %131 = arith.addf %128, %130 : vector<4x128xf32>
    %cst_7 = arith.constant 0.000000e+00 : f32
    %132 = vector.broadcast %cst_7 : f32 to vector<4x128xf32>
    %133 = arith.cmpf ogt, %131, %132 : vector<4x128xf32>
    %cst_8 = arith.constant 2.000000e-01 : f32
    %134 = vector.broadcast %cst_8 : f32 to vector<4x128xf32>
    %135 = arith.mulf %134, %131 : vector<4x128xf32>
    %136 = arith.select %133, %131, %135 : vector<4x128xi1>, vector<4x128xf32>
    %cst_9 = arith.constant dense<0.000000e+00> : vector<128xf32>
    %137 = vector.multi_reduction <add>, %136, %cst_9 [0] : vector<4x128xf32> to vector<128xf32>
    %138 = vector.shape_cast %137 : vector<128xf32> to vector<1x128xf32>
    %139 = arith.mulf %136, %136 : vector<4x128xf32>
    %cst_10 = arith.constant dense<0.000000e+00> : vector<128xf32>
    %140 = vector.multi_reduction <add>, %139, %cst_10 [0] : vector<4x128xf32> to vector<128xf32>
    %141 = vector.shape_cast %140 : vector<128xf32> to vector<1x128xf32>
    %cst_11 = arith.constant 2.500000e-01 : f32
    %142 = vector.broadcast %cst_11 : f32 to vector<1x128xf32>
    %143 = arith.mulf %138, %142 : vector<1x128xf32>
    %cst_12 = arith.constant 2.500000e-01 : f32
    %144 = vector.broadcast %cst_12 : f32 to vector<1x128xf32>
    %145 = arith.mulf %141, %144 : vector<1x128xf32>
    %146 = arith.mulf %143, %143 : vector<1x128xf32>
    %147 = arith.subf %145, %146 : vector<1x128xf32>
    %148 = vector.broadcast %143 : vector<1x128xf32> to vector<4x128xf32>
    %149 = arith.subf %136, %148 : vector<4x128xf32>
    %cst_13 = arith.constant 9.99999974E-6 : f32
    %150 = vector.broadcast %cst_13 : f32 to vector<1x128xf32>
    %151 = arith.addf %147, %150 : vector<1x128xf32>
    %152 = math.rsqrt %151 : vector<1x128xf32>
    %153 = vector.broadcast %152 : vector<1x128xf32> to vector<4x128xf32>
    %154 = arith.mulf %149, %153 : vector<4x128xf32>
    %c0_14 = arith.constant 0 : index
    %c0_15 = arith.constant 0 : index
    %155 = vector.load %arg4[%c0_14, %c0_15] : memref<128x128xf32, #tpu.memory_space<vmem>>, vector<128x128xf32>
    %cst_16 = arith.constant dense<0.000000e+00> : vector<4x128xf32>
    %156 = tpu.matmul %154, %155, %cst_16 {dimension_numbers = #tpu.dot_dimension_numbers<[1], [0], [0], [1], [0, 0, 1, 1], [], []>} : vector<4x128xf32>, vector<128x128xf32>, vector<4x128xf32> -> vector<4x128xf32>
    %c0_17 = arith.constant 0 : index
    %c0_18 = arith.constant 0 : index
    %157 = vector.load %arg5[%c0_17, %c0_18] : memref<1x128xf32, #tpu.memory_space<vmem>>, vector<1x128xf32>
    %158 = vector.broadcast %157 : vector<1x128xf32> to vector<4x128xf32>
    %159 = arith.addf %156, %158 : vector<4x128xf32>
    %cst_19 = arith.constant 0.000000e+00 : f32
    %160 = vector.broadcast %cst_19 : f32 to vector<4x128xf32>
    %161 = arith.cmpf ogt, %159, %160 : vector<4x128xf32>
    %cst_20 = arith.constant 2.000000e-01 : f32
    %162 = vector.broadcast %cst_20 : f32 to vector<4x128xf32>
    %163 = arith.mulf %162, %159 : vector<4x128xf32>
    %164 = arith.select %161, %159, %163 : vector<4x128xi1>, vector<4x128xf32>
    %c0_21 = arith.constant 0 : index
    %c0_22 = arith.constant 0 : index
    %165 = vector.load %arg6[%c0_21, %c0_22] : memref<4x128xf32, #tpu.memory_space<vmem>>, vector<4x128xf32>
    tpu.vector_store %arg6[%c0_21, %c0_22], %164 {strides = array<i32>} : memref<4x128xf32, #tpu.memory_space<vmem>>, vector<4x128xf32>,
    return
  }
}

</mosaic_0001>

<bundles_post_ra>
// kernel: tpu_custom_call.1
= control target key start
LH: loop header
LB: loop body
LE: loop exit
PB: predicated region body
PF: predicated region fallthrough
CT: control target
= control target key end

     0   :  { %11 = vsyncpa [#allocation3], 0  ;;  %s6662_s0 = inlined_call_operand.hbm [shape: s32[4,256], index: 0, kind: input, shape index: {}]   ;;  %s6663_s1 = inlined_call_operand.hbm [shape: s32[1,256], index: 1, kind: input, shape index: {}]   ;;  %s6664_s2 = inlined_call_operand.hbm [shape: bf16[6144,128], index: 2, kind: input, shape index: {}]   ;;  %s6665_s3 = inlined_call_operand.hbm [shape: f32[1,128], index: 3, kind: input, shape index: {}]   ;;  %s6666_s4 = inlined_call_operand.hbm [shape: f32[128,128], index: 4, kind: input, shape index: {}]   ;;  %s6667_s5 = inlined_call_operand.hbm [shape: f32[1,128], index: 5, kind: input, shape index: {}]   ;;  %s6668_s6 = inlined_call_operand.hbm [shape: f32[4,128], index: 6, kind: output, shape index: {}]  }
   0x1   :  { %12 = vsyncpa [#allocation6], 0 }
   0x2   :  { %13 = vsyncpa [#allocation9], 0 }
   0x3   :  { %14 = vsyncpa [#allocation12], 0  ;;  %s32_s23 = sshll.u32 %s6663_s1, 4  ;;  %s33_s23 = int_to_ptr.hbm [resolvable:$true] %s32_s23 }
   0x4   :  { %15 = vsyncpa [#allocation4], 0  ;;  %s6463_s24 = smov [#allocation5]   ;;  %s56_s28 = sshll.u32 %s6665_s3, 4  ;;  %s57_s28 = int_to_ptr.hbm [resolvable:$true] %s56_s28 }
   0x5   :  { %s34_s25 = sshll.u32 %s6463_s24, 4  ;;  %s6464_s29 = smov [#allocation8]   ;;  %s35_s25 = int_to_ptr.vmem [resolvable:$true] %s34_s25 }
   0x6   :  { %37 = dma.hbm_to_vmem [thread:$0]  %s33_s23, 32, %s35_s25, [#allocation6]  }
   0x7   :  { %s58_s30 = sshll.u32 %s6464_s29, 4  ;;  %s21_s9 = sshll.u32 %s6662_s0, 4  ;;  %s59_s30 = int_to_ptr.vmem [resolvable:$true] %s58_s30  ;;  %s22_s9 = int_to_ptr.hbm [resolvable:$true] %s21_s9 }
   0x8   :  { %61 = dma.hbm_to_vmem [thread:$0]  %s57_s28, 16, %s59_s30, [#allocation9]  }
   0x9   :  { %s42_s11 = sshll.u32 %s6664_s2, 4  ;;  %s6465_s12 = smov [#allocation2]   ;;  %s43_s11 = int_to_ptr.hbm [resolvable:$true] %s42_s11 }
   0xa   :  { %s23_s13 = sshll.u32 %s6465_s12, 4  ;;  %s6466_s3 = smov [#allocation7]   ;;  %s24_s13 = int_to_ptr.vmem [resolvable:$true] %s23_s13 }
   0xb   :  { %26 = dma.hbm_to_vmem [thread:$0]  %s22_s9, 128, %s24_s13, [#allocation3]  }
   0xc   :  { %s44_s14 = sshll.u32 %s6466_s3, 4  ;;  %s6467_s15 = smov 64   ;;  %s45_s14 = int_to_ptr.vmem [resolvable:$true] %s44_s14 }
   0xd   :  { %s6468_s16 = smov 4   ;;  %s66_s18 = sshll.u32 %s6666_s4, 4  ;;  %s67_s18 = int_to_ptr.hbm [resolvable:$true] %s66_s18 }
   0xe   :  { %50 = dma.hbm_to_vmem [thread:$0]  %s43_s11, 49152, %s45_s14, [#allocation6], %s6467_s15, %s6467_s15, %s6468_s16  }
   0xf   :  { %s6469_s19 = smov [#allocation10]   ;;  %s80_s22 = sshll.u32 %s6667_s5, 4  ;;  %s81_s22 = int_to_ptr.hbm [resolvable:$true] %s80_s22 }
  0x10   :  { %s68_s20 = sshll.u32 %s6469_s19, 4  ;;  %s6470_s23 = smov 128   ;;  %s69_s20 = int_to_ptr.vmem [resolvable:$true] %s68_s20 }
  0x11   :  { %s6471_s24 = smov 8   ;;  %s6472_s25 = smov [#allocation11]  }
  0x12   :  { %74 = dma.hbm_to_vmem [thread:$0]  %s67_s18, 2048, %s69_s20, [#allocation9], %s6470_s23, %s6470_s23, %s6471_s24  }
  0x13   :  { %s82_s26 = sshll.u32 %s6472_s25, 4  ;;  %s83_s26 = int_to_ptr.vmem [resolvable:$true] %s82_s26 }
  0x14   :  { %85 = dma.hbm_to_vmem [thread:$0]  %s81_s22, 16, %s83_s26, [#allocation12]  }
  0x15   :  { %6453 = dma.done.wait [#allocation3], 128  }
  0x16   :  { %6454 = vsyncadd [#allocation3], 4294967168 }
  0x17   :  { %6455 = dma.done.wait [#allocation6], 49184  }
  0x18   :  { %6456 = vsyncadd [#allocation6], 4294918112 }
  0x19   :  { %6457 = dma.done.wait [#allocation9], 2064  }
  0x1a   :  { %6458 = vsyncadd [#allocation9], 4294965232 }
  0x1b   :  { %6459 = dma.done.wait [#allocation12], 16  }
  0x1c   :  { %6460 = vsyncadd [#allocation12], 4294967280  ;;  %v5892_v0 = vld [vmem:[#allocation7 + $0x38] sm:$0xff]  ;;  %v5891_v4 = vld [vmem:[#allocation7 + $0x30] sm:$0xff]  ;;  %vm115_vm0 = vcmask 1043456   ;;  %v6473_v39 = vmov 0.0  }
  0x1d   :  { %v5900_v1 = vld [vmem:[#allocation7 + $0x78] sm:$0xff]  ;;  %3602 = vmatpush.bf16.msra.mxu0 %v5892_v0  ;;  %v5899_v5 = vld [vmem:[#allocation7 + $0x70] sm:$0xff]  ;;  %v5890_v8 = vld [vmem:[#allocation7 + $0x28] sm:$0xff]  ;;  %s6474_s4 = smov [#allocation13]   ;;  %s4312_s29 = sshll.u32 %s6668_s6, 4  ;;  %s4313_s29 = int_to_ptr.hbm [resolvable:$true] %s4312_s29 }
  0x1e   :  { %v5908_v2 = vld [vmem:[#allocation7 + $0xb8] sm:$0xff]  ;;  %3615 = vmatpush.bf16.msra.mxu1 %v5900_v1  ;;  %v5907_v6 = vld [vmem:[#allocation7 + $0xb0] sm:$0xff]  ;;  %v5898_v9 = vld [vmem:[#allocation7 + $0x68] sm:$0xff]  ;;  %s4310_s5 = sshll.u32 %s6474_s4, 4  ;;  %s4311_s5 = int_to_ptr.vmem [resolvable:$true] %s4310_s5 }
  0x1f   :  { %v5916_v3 = vld [vmem:[#allocation7 + $0xf8] sm:$0xff]  ;;  %3628 = vmatpush.bf16.msra.mxu2 %v5908_v2  ;;  %v5915_v7 = vld [vmem:[#allocation7 + $0xf0] sm:$0xff]  ;;  %v5906_v10 = vld [vmem:[#allocation7 + $0xa8] sm:$0xff] }
  0x20   :  { %3641 = vmatpush.bf16.msra.mxu3 %v5916_v3  ;;  %v5914_v11 = vld [vmem:[#allocation7 + $0xe8] sm:$0xff]  ;;  %v5889_v12 = vld [vmem:[#allocation7 + $0x20] sm:$0xff]  ;;  %v5888_v16 = vld [vmem:[#allocation7 + $0x18] sm:$0xff] }
  0x21   :  { %3603 = vmatpush.bf16.msra.mxu0 %v5891_v4  ;;  %v5897_v13 = vld [vmem:[#allocation7 + $0x60] sm:$0xff]  ;;  %v5896_v17 = vld [vmem:[#allocation7 + $0x58] sm:$0xff]  ;;  %v5887_v20 = vld [vmem:[#allocation7 + $0x10] sm:$0xff] }
  0x22   :  { %3616 = vmatpush.bf16.msra.mxu1 %v5899_v5  ;;  %v5905_v14 = vld [vmem:[#allocation7 + $0xa0] sm:$0xff]  ;;  %v5904_v18 = vld [vmem:[#allocation7 + $0x98] sm:$0xff]  ;;  %v5895_v21 = vld [vmem:[#allocation7 + $0x50] sm:$0xff] }
  0x23   :  { %3629 = vmatpush.bf16.msra.mxu2 %v5907_v6  ;;  %v5913_v15 = vld [vmem:[#allocation7 + $0xe0] sm:$0xff]  ;;  %v5912_v19 = vld [vmem:[#allocation7 + $0xd8] sm:$0xff]  ;;  %v5903_v23 = vld [vmem:[#allocation7 + $0x90] sm:$0xff] }
  0x24   :  { %3642 = vmatpush.bf16.msra.mxu3 %v5915_v7  ;;  %v111_v22 = vld [vmem:[#allocation5] sm:$0x3]  ;;  %v5911_v24 = vld [vmem:[#allocation7 + $0xd0] sm:$0xff]  ;;  %v5886_v29 = vld [vmem:[#allocation7 + $0x8] sm:$0xff] }
  0x25   :  { %3604 = vmatpush.bf16.msra.mxu0 %v5890_v8  ;;  %v112_v25 = vperm.slane %v111_v22, 0  ;;  %v113_v26 = vperm.slane %v111_v22, 1  ;;  %v110_v27 = vld [vmem:[#allocation2] sm:$0xff]  ;;  %v5894_v30 = vld [vmem:[#allocation7 + $0x48] sm:$0xff]  ;;  %v5885_v35 = vld [vmem:[#allocation7] sm:$0xff] }
  0x26   :  { %3617 = vmatpush.bf16.msra.mxu1 %v5898_v9  ;;  %v5902_v31 = vld [vmem:[#allocation7 + $0x88] sm:$0xff]  ;;  %v5893_v36 = vld [vmem:[#allocation7 + $0x40] sm:$0xff]  ;;  %v5924_v41 = vld [vmem:[#allocation7 + $0x138] sm:$0xff] }
  0x27   :  { %3630 = vmatpush.bf16.msra.mxu2 %v5906_v10  ;;  %v114_v28 = vrot.slane %v113_v26, 4  ;;  %v5910_v32 = vld [vmem:[#allocation7 + $0xc8] sm:$0xff]  ;;  %v5901_v37 = vld [vmem:[#allocation7 + $0x80] sm:$0xff]  ;;  %v5932_v42 = vld [vmem:[#allocation7 + $0x178] sm:$0xff] }
  0x28   :  { %3643 = vmatpush.bf16.msra.mxu3 %v5914_v11  ;;  %v5909_v38 = vld [vmem:[#allocation7 + $0xc0] sm:$0xff]  ;;  %v5940_v43 = vld [vmem:[#allocation7 + $0x1b8] sm:$0xff]  ;;  %v5923_v45 = vld [vmem:[#allocation7 + $0x130] sm:$0xff] }
  0x29   :  { %3605 = vmatpush.bf16.msra.mxu0 %v5889_v12  ;;  %v116_v33 = vsel %vm115_vm0, %v112_v25, %v114_v28  ;;  %v5948_v44 = vld [vmem:[#allocation7 + $0x1f8] sm:$0xff]  ;;  %v5931_v46 = vld [vmem:[#allocation7 + $0x170] sm:$0xff]  ;;  %v5922_v52 = vld [vmem:[#allocation7 + $0x128] sm:$0xff] }
  0x2a   :  { %3618 = vmatpush.bf16.msra.mxu1 %v5897_v13  ;;  %v6529_v34 = vadd.s32 %v116_v33, %v110_v27  ;;  %v5939_v47 = vld [vmem:[#allocation7 + $0x1b0] sm:$0xff]  ;;  %v5930_v53 = vld [vmem:[#allocation7 + $0x168] sm:$0xff]  ;;  %v5921_v59 = vld [vmem:[#allocation7 + $0x120] sm:$0xff] }
  0x2b   :  { %3631 = vmatpush.bf16.msra.mxu2 %v5905_v14  ;;  %v5947_v48 = vld [vmem:[#allocation7 + $0x1f0] sm:$0xff]  ;;  %v5938_v55 = vld [vmem:[#allocation7 + $0x1a8] sm:$0xff]  ;;  %v5929_v60 = vld [vmem:[#allocation7 + $0x160] sm:$0xff] }
  0x2c   :  { %3644 = vmatpush.bf16.msra.mxu3 %v5913_v15  ;;  %vm118_vm1 = vcmp.eq.s32.totalorder %v6529_v34, 0  ;;  %vm128_vm2 = vcmp.eq.s32.totalorder %v6529_v34, 1  ;;  %v5946_v56 = vld [vmem:[#allocation7 + $0x1e8] sm:$0xff]  ;;  %vm138_vm3 = vcmp.eq.s32.totalorder %v6529_v34, 2  ;;  %v5937_v63 = vld [vmem:[#allocation7 + $0x1a0] sm:$0xff]  ;;  %v5920_v4 = vld [vmem:[#allocation7 + $0x118] sm:$0xff] }
  0x2d   :  { %3606 = vmatpush.bf16.msra.mxu0 %v5888_v16  ;;  %v4325_v40 = vsel %vm118_vm1, 1.0, %v6473_v39  ;;  %v4326_v49 = vsel %vm128_vm2, 1.0, %v6473_v39  ;;  %v5945_v0 = vld [vmem:[#allocation7 + $0x1e0] sm:$0xff]  ;;  %v4327_v1 = vsel %vm138_vm3, 1.0, %v6473_v39  ;;  %v5928_v5 = vld [vmem:[#allocation7 + $0x158] sm:$0xff]  ;;  %vm148_vm4 = vcmp.eq.s32.totalorder %v6529_v34, 3 }
  0x2e   :  { %3619 = vmatpush.bf16.msra.mxu1 %v5896_v17  ;;  %122 = vst [vmem:[#allocation1] ss:$2 sm:$0xff] %v4325_v40  ;;  %v5936_v7 = vld [vmem:[#allocation7 + $0x198] sm:$0xff]  ;;  %v5919_v11 = vld [vmem:[#allocation7 + $0x110] sm:$0xff]  ;;  %v4328_v17 = vsel %vm148_vm4, 1.0, %v6473_v39  ;;  %vm158_vm5 = vcmp.eq.s32.totalorder %v6529_v34, 4 }
  0x2f   :  { %3632 = vmatpush.bf16.msra.mxu2 %v5904_v18  ;;  %v5944_v8 = vld [vmem:[#allocation7 + $0x1d8] sm:$0xff]  ;;  %v5927_v12 = vld [vmem:[#allocation7 + $0x150] sm:$0xff]  ;;  %v5917_v25 = vld [vmem:[#allocation7 + $0x100] sm:$0xff]  ;;  %vm168_vm6 = vcmp.eq.s32.totalorder %v6529_v34, 5  ;;  %vm178_vm7 = vcmp.eq.s32.totalorder %v6529_v34, 6  ;;  %vm188_vm8 = vcmp.eq.s32.totalorder %v6529_v34, 7 }
  0x30   :  { %3645 = vmatpush.bf16.msra.mxu3 %v5912_v19  ;;  %v5935_v15 = vld [vmem:[#allocation7 + $0x190] sm:$0xff]  ;;  %v5925_v26 = vld [vmem:[#allocation7 + $0x140] sm:$0xff]  ;;  %v5964_v33 = vld [vmem:[#allocation7 + $0x278] sm:$0xff]  ;;  %vm198_vm9 = vcmp.eq.s32.totalorder %v6529_v34, 8  ;;  %vm208_vm10 = vcmp.eq.s32.totalorder %v6529_v34, 9  ;;  %vm218_vm11 = vcmp.eq.s32.totalorder %v6529_v34, 10 }
  0x31   :  { %3607 = vmatpush.bf16.msra.mxu0 %v5887_v20  ;;  %v5943_v16 = vld [vmem:[#allocation7 + $0x1d0] sm:$0xff]  ;;  %v5918_v20 = vld [vmem:[#allocation7 + $0x108] sm:$0xff]  ;;  %vm228_vm12 = vcmp.eq.s32.totalorder %v6529_v34, 11  ;;  %vm238_vm13 = vcmp.eq.s32.totalorder %v6529_v34, 12  ;;  %vm248_vm14 = vcmp.eq.s32.totalorder %v6529_v34, 13  ;;  %vm258_vm15 = vcmp.eq.s32.totalorder %v6529_v34, 14 }
  0x32   :  { %3620 = vmatpush.bf16.msra.mxu1 %v5895_v21  ;;  %v5926_v21 = vld [vmem:[#allocation7 + $0x148] sm:$0xff]  ;;  %vm268_vm1 = vcmp.eq.s32.totalorder %v6529_v34, 15  ;;  %vm278_vm2 = vcmp.eq.s32.totalorder %v6529_v34, 16  ;;  %vm288_vm3 = vcmp.eq.s32.totalorder %v6529_v34, 17  ;;  %vm298_vm4 = vcmp.eq.s32.totalorder %v6529_v34, 18 }
  0x33   :  { %3633 = vmatpush.bf16.msra.mxu2 %v5903_v23  ;;  %v5934_v23 = vld [vmem:[#allocation7 + $0x188] sm:$0xff] }
  0x34   :  { %3646 = vmatpush.bf16.msra.mxu3 %v5911_v24  ;;  %v5942_v24 = vld [vmem:[#allocation7 + $0x1c8] sm:$0xff] }
  0x35   :  { %3608 = vmatpush.bf16.msra.mxu0 %v5886_v29  ;;  %v123_v50 = vld.sshfl [vmem:[#allocation1] sm:$0xff pattern:$0x75316420]  ;;  %v124_v51 = vld.sshfl [vmem:[#allocation1 + $0x8] sm:$0xff pattern:$0x75316420] }
  0x36   :  { %3621 = vmatpush.bf16.msra.mxu1 %v5894_v30  ;;  %132 = vst [vmem:[#allocation1] ss:$2 sm:$0xff] %v4326_v49  ;;  %v127_v54 = vpack.c.bf16 %v124_v51, %v123_v50  ;;  %v5933_v29 = vld [vmem:[#allocation7 + $0x180] sm:$0xff]  ;;  %v5954_v51 = vld [vmem:[#allocation7 + $0x228] sm:$0xff] }
  0x37   :  { %3634 = vmatpush.bf16.msra.mxu2 %v5902_v31  ;;  %v5941_v30 = vld [vmem:[#allocation7 + $0x1c0] sm:$0xff]  ;;  %v5956_v31 = vld [vmem:[#allocation7 + $0x238] sm:$0xff] }
  0x38   :  { %3647 = vmatpush.bf16.msra.mxu3 %v5910_v32  ;;  %v359_v57 = vunpack.c.l.b16 %v127_v54  ;;  %v360_v58 = vunpack.c.h.b16 %v127_v54  ;;  %v4329_v32 = vsel %vm158_vm5, 1.0, %v6473_v39  ;;  %v5970_v54 = vld [vmem:[#allocation7 + $0x2a8] sm:$0xff]  ;;  %vm308_vm5 = vcmp.eq.s32.totalorder %v6529_v34, 19 }
  0x39   :  { %3609 = vmatpush.bf16.msra.mxu0 %v5885_v35  ;;  %v5972_v35 = vld [vmem:[#allocation7 + $0x2b8] sm:$0xff] }
  0x3a   :  { %3622 = vmatpush.bf16.msra.mxu1 %v5893_v36  ;;  %v361_v61 = vpack.c.b16 %v359_v57, %v359_v57  ;;  %v362_v62 = vpack.c.b16 %v360_v58, %v360_v58  ;;  %v5980_v36 = vld [vmem:[#allocation7 + $0x2f8] sm:$0xff]  ;;  %v5953_v58 = vld [vmem:[#allocation7 + $0x220] sm:$0xff] }
  0x3b   :  { %3635 = vmatpush.bf16.msra.mxu2 %v5901_v37 }
  0x3c   :  { %3648 = vmatpush.bf16.msra.mxu3 %v5909_v38  ;;  %3610 = vmatmul.bf16.vlgmr.msra.gmra.mxu0 %v361_v61  ;;  %v5977_v61 = vld [vmem:[#allocation7 + $0x2e0] sm:$0xff] }
  0x3d   :  { %3654 = vmatpush.bf16.msrb.mxu0 %v5924_v41  ;;  %3623 = vmatmul.bf16.vlgmr.msra.gmra.mxu1 %v362_v62  ;;  %v133_v2 = vld.sshfl [vmem:[#allocation1] sm:$0xff pattern:$0x75316420]  ;;  %v134_v3 = vld.sshfl [vmem:[#allocation1 + $0x8] sm:$0xff pattern:$0x75316420] }
  0x3e   :  { %3667 = vmatpush.bf16.msrb.mxu1 %v5932_v42  ;;  %v137_v6 = vpack.c.bf16 %v134_v3, %v133_v2  ;;  %142 = vst [vmem:[#allocation1] ss:$2 sm:$0xff] %v4327_v1  ;;  %v5952_v62 = vld [vmem:[#allocation7 + $0x218] sm:$0xff] }
  0x3f   :  { %3680 = vmatpush.bf16.msrb.mxu2 %v5940_v43  ;;  %v5955_v43 = vld [vmem:[#allocation7 + $0x230] sm:$0xff]  ;;  %v5968_v1 = vld [vmem:[#allocation7 + $0x298] sm:$0xff] }
  0x40   :  { %3693 = vmatpush.bf16.msrb.mxu3 %v5948_v44  ;;  %v366_v9 = vunpack.c.l.b16 %v137_v6  ;;  %v367_v10 = vunpack.c.h.b16 %v137_v6  ;;  %v5963_v44 = vld [vmem:[#allocation7 + $0x270] sm:$0xff]  ;;  %v5976_v2 = vld [vmem:[#allocation7 + $0x2d8] sm:$0xff] }
  0x41   :  { %3655 = vmatpush.bf16.msrb.mxu0 %v5923_v45  ;;  %v5959_v6 = vld [vmem:[#allocation7 + $0x250] sm:$0xff] }
  0x42   :  { %3668 = vmatpush.bf16.msrb.mxu1 %v5931_v46  ;;  %v368_v13 = vpack.c.b16 %v366_v9, %v366_v9  ;;  %v369_v14 = vpack.c.b16 %v367_v10, %v367_v10  ;;  %v5950_v9 = vld [vmem:[#allocation7 + $0x208] sm:$0xff] }
  0x43   :  { %3681 = vmatpush.bf16.msrb.mxu2 %v5939_v47  ;;  %v5971_v47 = vld [vmem:[#allocation7 + $0x2b0] sm:$0xff]  ;;  %v5958_v10 = vld [vmem:[#allocation7 + $0x248] sm:$0xff] }
  0x44   :  { %3694 = vmatpush.bf16.msrb.mxu3 %v5947_v48  ;;  %3636 = vmatmul.bf16.vlgmr.msra.gmra.mxu2 %v368_v13  ;;  %v5979_v48 = vld [vmem:[#allocation7 + $0x2f0] sm:$0xff]  ;;  %v4332_v13 = vsel %vm188_vm8, 1.0, %v6473_v39  ;;  %vm338_vm8 = vcmp.eq.s32.totalorder %v6529_v34, 22 }
  0x45   :  { %3656 = vmatpush.bf16.msrb.mxu0 %v5922_v52  ;;  %3649 = vmatmul.bf16.vlgmr.msra.gmra.mxu3 %v369_v14  ;;  %v143_v18 = vld.sshfl [vmem:[#allocation1] sm:$0xff pattern:$0x75316420]  ;;  %v144_v19 = vld.sshfl [vmem:[#allocation1 + $0x8] sm:$0xff pattern:$0x75316420] }
  0x46   :  { %3669 = vmatpush.bf16.msrb.mxu1 %v5930_v53  ;;  %152 = vst [vmem:[#allocation1] ss:$2 sm:$0xff] %v4328_v17  ;;  %v147_v22 = vpack.c.bf16 %v144_v19, %v143_v18  ;;  %v4330_v52 = vsel %vm168_vm6, 1.0, %v6473_v39  ;;  %v5962_v53 = vld [vmem:[#allocation7 + $0x268] sm:$0xff]  ;;  %v5949_v18 = vld [vmem:[#allocation7 + $0x200] sm:$0xff]  ;;  %vm318_vm6 = vcmp.eq.s32.totalorder %v6529_v34, 20 }
  0x47   :  { %3682 = vmatpush.bf16.msrb.mxu2 %v5938_v55  ;;  %v5978_v55 = vld [vmem:[#allocation7 + $0x2e8] sm:$0xff]  ;;  %v5957_v19 = vld [vmem:[#allocation7 + $0x240] sm:$0xff] }
  0x48   :  { %3695 = vmatpush.bf16.msrb.mxu3 %v5946_v56  ;;  %v373_v27 = vunpack.c.l.b16 %v147_v22  ;;  %v374_v28 = vunpack.c.h.b16 %v147_v22  ;;  %v5966_v14 = vld [vmem:[#allocation7 + $0x288] sm:$0xff]  ;;  %v5965_v22 = vld [vmem:[#allocation7 + $0x280] sm:$0xff] }
  0x49   :  { %3657 = vmatpush.bf16.msrb.mxu0 %v5921_v59  ;;  %v5961_v59 = vld [vmem:[#allocation7 + $0x260] sm:$0xff] }
  0x4a   :  { %3670 = vmatpush.bf16.msrb.mxu1 %v5929_v60  ;;  %v375_v41 = vpack.c.b16 %v373_v27, %v373_v27  ;;  %v376_v42 = vpack.c.b16 %v374_v28, %v374_v28  ;;  %v5969_v60 = vld [vmem:[#allocation7 + $0x2a0] sm:$0xff]  ;;  %v5996_v27 = vld [vmem:[#allocation7 + $0x378] sm:$0xff] }
  0x4b   :  { %3683 = vmatpush.bf16.msrb.mxu2 %v5937_v63  ;;  %v4331_v63 = vsel %vm178_vm7, 1.0, %v6473_v39  ;;  %v6004_v28 = vld [vmem:[#allocation7 + $0x3b8] sm:$0xff]  ;;  %vm328_vm7 = vcmp.eq.s32.totalorder %v6529_v34, 21 }
  0x4c   :  { %3696 = vmatpush.bf16.msrb.mxu3 %v5945_v0  ;;  %v5960_v0 = vld [vmem:[#allocation7 + $0x258] sm:$0xff] }
  0x4d   :  { %3658 = vmatpush.bf16.msrb.mxu0 %v5920_v4  ;;  %v153_v37 = vld.sshfl [vmem:[#allocation1] sm:$0xff pattern:$0x75316420]  ;;  %v154_v38 = vld.sshfl [vmem:[#allocation1 + $0x8] sm:$0xff pattern:$0x75316420] }
  0x4e   :  { %3671 = vmatpush.bf16.msrb.mxu1 %v5928_v5  ;;  %v157_v40 = vpack.c.bf16 %v154_v38, %v153_v37  ;;  %162 = vst [vmem:[#allocation1] ss:$2 sm:$0xff] %v4329_v32  ;;  %v5951_v5 = vld [vmem:[#allocation7 + $0x210] sm:$0xff] }
  0x4f   :  { %3684 = vmatpush.bf16.msrb.mxu2 %v5936_v7  ;;  %v5967_v7 = vld [vmem:[#allocation7 + $0x290] sm:$0xff] }
  0x50   :  { %3697 = vmatpush.bf16.msrb.mxu3 %v5944_v8  ;;  %v380_v45 = vunpack.c.l.b16 %v157_v40  ;;  %v381_v46 = vunpack.c.h.b16 %v157_v40  ;;  %v5975_v8 = vld [vmem:[#allocation7 + $0x2d0] sm:$0xff]  ;;  %v5986_v40 = vld [vmem:[#allocation7 + $0x328] sm:$0xff] }
  0x51   :  { %3659 = vmatpush.bf16.msrb.mxu0 %v5919_v11  ;;  %v6003_v37 = vld [vmem:[#allocation7 + $0x3b0] sm:$0xff] }
  0x52   :  { %3672 = vmatpush.bf16.msrb.mxu1 %v5927_v12  ;;  %v382_v49 = vpack.c.b16 %v380_v45, %v380_v45  ;;  %v383_v50 = vpack.c.b16 %v381_v46, %v381_v46  ;;  %v6011_v38 = vld [vmem:[#allocation7 + $0x3f0] sm:$0xff]  ;;  %v5985_v45 = vld [vmem:[#allocation7 + $0x320] sm:$0xff] }
  0x53   :  { %3685 = vmatpush.bf16.msrb.mxu2 %v5935_v15  ;;  %v5974_v15 = vld [vmem:[#allocation7 + $0x2c8] sm:$0xff]  ;;  %v5993_v46 = vld [vmem:[#allocation7 + $0x360] sm:$0xff] }
  0x54   :  { %3698 = vmatpush.bf16.msrb.mxu3 %v5943_v16 }
  0x55   :  { %3660 = vmatpush.bf16.msrb.mxu0 %v5918_v20  ;;  %v163_v56 = vld.sshfl [vmem:[#allocation1] sm:$0xff pattern:$0x75316420]  ;;  %v164_v57 = vld.sshfl [vmem:[#allocation1 + $0x8] sm:$0xff pattern:$0x75316420] }
  0x56   :  { %3673 = vmatpush.bf16.msrb.mxu1 %v5926_v21  ;;  %172 = vst [vmem:[#allocation1] ss:$2 sm:$0xff] %v4330_v52  ;;  %v167_v11 = vpack.c.bf16 %v164_v57, %v163_v56  ;;  %v5992_v52 = vld [vmem:[#allocation7 + $0x358] sm:$0xff]  ;;  %v5991_v56 = vld [vmem:[#allocation7 + $0x350] sm:$0xff] }
  0x57   :  { %3686 = vmatpush.bf16.msrb.mxu2 %v5934_v23  ;;  %v5973_v23 = vld [vmem:[#allocation7 + $0x2c0] sm:$0xff] }
  0x58   :  { %3699 = vmatpush.bf16.msrb.mxu3 %v5942_v24  ;;  %v387_v20 = vunpack.c.l.b16 %v167_v11  ;;  %v388_v24 = vunpack.c.h.b16 %v167_v11 }
  0x59   :  { %3661 = vmatpush.bf16.msrb.mxu0 %v5917_v25 }
  0x5a   :  { %3674 = vmatpush.bf16.msrb.mxu1 %v5925_v26  ;;  %v5988_v26 = vld [vmem:[#allocation7 + $0x338] sm:$0xff]  ;;  %v390_v32 = vpack.c.b16 %v388_v24, %v388_v24  ;;  %v6018_v24 = vld [vmem:[#allocation7 + $0x428] sm:$0xff] }
  0x5b   :  { %3687 = vmatpush.bf16.msrb.mxu2 %v5933_v29  ;;  %v6012_v29 = vld [vmem:[#allocation7 + $0x3f8] sm:$0xff] }
  0x5c   :  { %3700 = vmatpush.bf16.msrb.mxu3 %v5941_v30  ;;  %3662 = vmatmul.bf16.vlgmr.msrb.gmra.mxu0 %v375_v41  ;;  %v389_v30 = vpack.c.b16 %v387_v20, %v387_v20  ;;  %v5994_v41 = vld [vmem:[#allocation7 + $0x368] sm:$0xff]  ;;  %v6019_v20 = vld [vmem:[#allocation7 + $0x430] sm:$0xff] }
  0x5d   :  { %3706 = vmatpush.bf16.msra.mxu0 %v5956_v31  ;;  %3675 = vmatmul.bf16.vlgmr.msrb.gmra.mxu1 %v376_v42  ;;  %v173_v3 = vld.sshfl [vmem:[#allocation1] sm:$0xff pattern:$0x75316420]  ;;  %v174_v4 = vld.sshfl [vmem:[#allocation1 + $0x8] sm:$0xff pattern:$0x75316420] }
  0x5e   :  { %3719 = vmatpush.bf16.msra.mxu1 %v5964_v33  ;;  %3688 = vmatmul.bf16.vlgmr.msrb.gmra.mxu2 %v382_v49  ;;  %182 = vst [vmem:[#allocation1] ss:$2 sm:$0xff] %v4331_v63  ;;  %v177_v12 = vpack.c.bf16 %v174_v4, %v173_v3  ;;  %v6002_v42 = vld [vmem:[#allocation7 + $0x3a8] sm:$0xff]  ;;  %v6001_v49 = vld [vmem:[#allocation7 + $0x3a0] sm:$0xff] }
  0x5f   :  { %3732 = vmatpush.bf16.msra.mxu2 %v5972_v35  ;;  %3701 = vmatmul.bf16.vlgmr.msrb.gmra.mxu3 %v383_v50  ;;  %v5987_v35 = vld [vmem:[#allocation7 + $0x330] sm:$0xff]  ;;  %v6009_v50 = vld [vmem:[#allocation7 + $0x3e0] sm:$0xff]  ;;  %v5990_v63 = vld [vmem:[#allocation7 + $0x348] sm:$0xff] }
  0x60   :  { %3745 = vmatpush.bf16.msra.mxu3 %v5980_v36  ;;  %v394_v21 = vunpack.c.l.b16 %v177_v12  ;;  %v395_v25 = vunpack.c.h.b16 %v177_v12  ;;  %v5995_v36 = vld [vmem:[#allocation7 + $0x370] sm:$0xff]  ;;  %v6006_v3 = vld [vmem:[#allocation7 + $0x3c8] sm:$0xff]  ;;  %v5981_v4 = vld [vmem:[#allocation7 + $0x300] sm:$0xff] }
  0x61   :  { %3707 = vmatpush.bf16.msra.mxu0 %v5955_v43  ;;  %v6010_v43 = vld [vmem:[#allocation7 + $0x3e8] sm:$0xff]  ;;  %v6020_v12 = vld [vmem:[#allocation7 + $0x438] sm:$0xff] }
  0x62   :  { %3720 = vmatpush.bf16.msra.mxu1 %v5963_v44  ;;  %v396_v31 = vpack.c.b16 %v394_v21, %v394_v21  ;;  %v397_v33 = vpack.c.b16 %v395_v25, %v395_v25  ;;  %v6027_v21 = vld [vmem:[#allocation7 + $0x470] sm:$0xff]  ;;  %v6026_v25 = vld [vmem:[#allocation7 + $0x468] sm:$0xff] }
  0x63   :  { %3733 = vmatpush.bf16.msra.mxu2 %v5971_v47 }
  0x64   :  { %3746 = vmatpush.bf16.msra.mxu3 %v5979_v48  ;;  %v4333_v48 = vsel %vm198_vm9, 1.0, %v6473_v39  ;;  %vm348_vm9 = vcmp.eq.s32.totalorder %v6529_v34, 23  ;;  %v6207_v34 = vld [vmem:[#allocation7 + $0xa10] sm:$0xff] }
  0x65   :  { %3708 = vmatpush.bf16.msra.mxu0 %v5954_v51  ;;  %v6547_v16 = vld.sshfl [vmem:[#allocation1] sm:$0xff pattern:$0x75316420]  ;;  %v6549_v17 = vld.sshfl [vmem:[#allocation1 + $0x8] sm:$0xff pattern:$0x75316420] }
  0x66   :  { %3721 = vmatpush.bf16.msra.mxu1 %v5962_v53  ;;  %192 = vst [vmem:[#allocation1] ss:$2 sm:$0xff] %v4332_v13  ;;  %v5984_v51 = vld [vmem:[#allocation7 + $0x318] sm:$0xff] }
  0x67   :  { %3734 = vmatpush.bf16.msra.mxu2 %v5970_v54  ;;  %v6000_v53 = vld [vmem:[#allocation7 + $0x398] sm:$0xff] }
  0x68   :  { %3747 = vmatpush.bf16.msra.mxu3 %v5978_v55  ;;  %v6008_v54 = vld [vmem:[#allocation7 + $0x3d8] sm:$0xff]  ;;  %v5983_v55 = vld [vmem:[#allocation7 + $0x310] sm:$0xff] }
  0x69   :  { %3709 = vmatpush.bf16.msra.mxu0 %v5953_v58  ;;  %v6028_v13 = vld [vmem:[#allocation7 + $0x478] sm:$0xff] }
  0x6a   :  { %3722 = vmatpush.bf16.msra.mxu1 %v5961_v59  ;;  %v5999_v59 = vld [vmem:[#allocation7 + $0x390] sm:$0xff] }
  0x6b   :  { %3735 = vmatpush.bf16.msra.mxu2 %v5969_v60  ;;  %v6007_v60 = vld [vmem:[#allocation7 + $0x3d0] sm:$0xff] }
  0x6c   :  { %3748 = vmatpush.bf16.msra.mxu3 %v5977_v61  ;;  %v4334_v61 = vsel %vm208_vm10, 1.0, %v6473_v39 }
  0x6d   :  { %3710 = vmatpush.bf16.msra.mxu0 %v5952_v62  ;;  %v193_v44 = vld.sshfl [vmem:[#allocation1] sm:$0xff pattern:$0x75316420]  ;;  %v194_v47 = vld.sshfl [vmem:[#allocation1 + $0x8] sm:$0xff pattern:$0x75316420] }
  0x6e   :  { %3723 = vmatpush.bf16.msra.mxu1 %v5960_v0  ;;  %202 = vst [vmem:[#allocation1] ss:$2 sm:$0xff] %v4333_v48  ;;  %v5982_v62 = vld [vmem:[#allocation7 + $0x308] sm:$0xff]  ;;  %v187_v0 = vpack.c.bf16 %v6549_v17, %v6547_v16 }
  0x6f   :  { %3736 = vmatpush.bf16.msra.mxu2 %v5968_v1  ;;  %v197_v1 = vpack.c.bf16 %v194_v47, %v193_v44  ;;  %v4336_v47 = vsel %vm228_vm12, 1.0, %v6473_v39  ;;  %v6014_v48 = vld [vmem:[#allocation7 + $0x408] sm:$0xff] }
  0x70   :  { %3749 = vmatpush.bf16.msra.mxu3 %v5976_v2  ;;  %v5998_v2 = vld [vmem:[#allocation7 + $0x388] sm:$0xff] }
  0x71   :  { %3711 = vmatpush.bf16.msra.mxu0 %v5951_v5  ;;  %v5989_v5 = vld [vmem:[#allocation7 + $0x340] sm:$0xff]  ;;  %v409_v11 = vunpack.c.h.b16 %v197_v1 }
  0x72   :  { %3724 = vmatpush.bf16.msra.mxu1 %v5959_v6  ;;  %v401_v6 = vunpack.c.l.b16 %v187_v0 }
  0x73   :  { %3737 = vmatpush.bf16.msra.mxu2 %v5967_v7  ;;  %v408_v7 = vunpack.c.l.b16 %v197_v1  ;;  %v6060_v1 = vld [vmem:[#allocation7 + $0x578] sm:$0xff] }
  0x74   :  { %3750 = vmatpush.bf16.msra.mxu3 %v5975_v8  ;;  %v5997_v8 = vld [vmem:[#allocation7 + $0x380] sm:$0xff]  ;;  %v403_v16 = vpack.c.b16 %v401_v6, %v401_v6  ;;  %v6051_v6 = vld [vmem:[#allocation7 + $0x530] sm:$0xff] }
  0x75   :  { %3712 = vmatpush.bf16.msra.mxu0 %v5950_v9  ;;  %v6554_v57 = vld.sshfl [vmem:[#allocation1] sm:$0xff pattern:$0x75316420]  ;;  %v6556_v58 = vld.sshfl [vmem:[#allocation1 + $0x8] sm:$0xff pattern:$0x75316420]  ;;  %v410_v17 = vpack.c.b16 %v408_v7, %v408_v7 }
  0x76   :  { %3725 = vmatpush.bf16.msra.mxu1 %v5958_v10  ;;  %212 = vst [vmem:[#allocation1] ss:$2 sm:$0xff] %v4334_v61  ;;  %v6005_v9 = vld [vmem:[#allocation7 + $0x3c0] sm:$0xff]  ;;  %v402_v10 = vunpack.c.h.b16 %v187_v0  ;;  %v6052_v0 = vld [vmem:[#allocation7 + $0x538] sm:$0xff]  ;;  %v6059_v7 = vld [vmem:[#allocation7 + $0x570] sm:$0xff] }
  0x77   :  { %3738 = vmatpush.bf16.msra.mxu2 %v5966_v14  ;;  %v6036_v14 = vld [vmem:[#allocation7 + $0x4b8] sm:$0xff]  ;;  %v6037_v61 = vld [vmem:[#allocation7 + $0x4c0] sm:$0xff] }
  0x78   :  { %3751 = vmatpush.bf16.msra.mxu3 %v5974_v15  ;;  %v6044_v15 = vld [vmem:[#allocation7 + $0x4f8] sm:$0xff] }
  0x79   :  { %3713 = vmatpush.bf16.msra.mxu0 %v5949_v18  ;;  %v404_v18 = vpack.c.b16 %v402_v10, %v402_v10  ;;  %v6050_v10 = vld [vmem:[#allocation7 + $0x528] sm:$0xff] }
  0x7a   :  { %3726 = vmatpush.bf16.msra.mxu1 %v5957_v19  ;;  %v411_v19 = vpack.c.b16 %v409_v11, %v409_v11  ;;  %v6058_v11 = vld [vmem:[#allocation7 + $0x568] sm:$0xff] }
  0x7b   :  { %3739 = vmatpush.bf16.msra.mxu2 %v5965_v22  ;;  %v6035_v22 = vld [vmem:[#allocation7 + $0x4b0] sm:$0xff] }
  0x7c   :  { %3752 = vmatpush.bf16.msra.mxu3 %v5973_v23  ;;  %3714 = vmatmul.bf16.vlgmr.msra.gmra.mxu0 %v389_v30  ;;  %v6043_v23 = vld [vmem:[#allocation7 + $0x4f0] sm:$0xff]  ;;  %v6025_v30 = vld [vmem:[#allocation7 + $0x460] sm:$0xff] }
  0x7d   :  { %3758 = vmatpush.bf16.msrb.mxu0 %v5988_v26  ;;  %3727 = vmatmul.bf16.vlgmr.msra.gmra.mxu1 %v390_v32  ;;  %v6034_v26 = vld [vmem:[#allocation7 + $0x4a8] sm:$0xff]  ;;  %v4335_v32 = vsel %vm218_vm11, 1.0, %v6473_v39 }
  0x7e   :  { %3771 = vmatpush.bf16.msrb.mxu1 %v5996_v27  ;;  %3740 = vmatmul.bf16.vlgmr.msra.gmra.mxu2 %v396_v31  ;;  %v6042_v27 = vld [vmem:[#allocation7 + $0x4e8] sm:$0xff]  ;;  %v214_v31 = vld.sshfl [vmem:[#allocation1 + $0x8] sm:$0xff pattern:$0x75316420] }
  0x7f   :  { %3784 = vmatpush.bf16.msrb.mxu2 %v6004_v28  ;;  %3753 = vmatmul.bf16.vlgmr.msra.gmra.mxu3 %v397_v33  ;;  %v213_v28 = vld.sshfl [vmem:[#allocation1] sm:$0xff pattern:$0x75316420]  ;;  %v6033_v33 = vld [vmem:[#allocation7 + $0x4a0] sm:$0xff] }
  0x80   :  { %3797 = vmatpush.bf16.msrb.mxu3 %v6012_v29  ;;  %v6017_v29 = vld [vmem:[#allocation7 + $0x420] sm:$0xff]  ;;  %222 = vst [vmem:[#allocation1] ss:$2 sm:$0xff] %v4335_v32  ;;  %v6071_v32 = vld [vmem:[#allocation7 + $0x5d0] sm:$0xff] }
  0x81   :  { %3759 = vmatpush.bf16.msrb.mxu0 %v5987_v35  ;;  %v6041_v35 = vld [vmem:[#allocation7 + $0x4e0] sm:$0xff] }
  0x82   :  { %3772 = vmatpush.bf16.msrb.mxu1 %v5995_v36  ;;  %v6016_v36 = vld [vmem:[#allocation7 + $0x418] sm:$0xff] }
  0x83   :  { %3785 = vmatpush.bf16.msrb.mxu2 %v6003_v37  ;;  %v6024_v37 = vld [vmem:[#allocation7 + $0x458] sm:$0xff] }
  0x84   :  { %3798 = vmatpush.bf16.msrb.mxu3 %v6011_v38  ;;  %v6032_v38 = vld [vmem:[#allocation7 + $0x498] sm:$0xff] }
  0x85   :  { %3760 = vmatpush.bf16.msrb.mxu0 %v5986_v40  ;;  %v6040_v40 = vld [vmem:[#allocation7 + $0x4d8] sm:$0xff] }
  0x86   :  { %3773 = vmatpush.bf16.msrb.mxu1 %v5994_v41  ;;  %v6015_v41 = vld [vmem:[#allocation7 + $0x410] sm:$0xff] }
  0x87   :  { %3786 = vmatpush.bf16.msrb.mxu2 %v6002_v42  ;;  %v6023_v42 = vld [vmem:[#allocation7 + $0x450] sm:$0xff] }
  0x88   :  { %3799 = vmatpush.bf16.msrb.mxu3 %v6010_v43  ;;  %v6564_v43 = vld.sshfl [vmem:[#allocation1] sm:$0xff pattern:$0x75316420]  ;;  %v6566_v44 = vld.sshfl [vmem:[#allocation1 + $0x8] sm:$0xff pattern:$0x75316420] }
  0x89   :  { %3761 = vmatpush.bf16.msrb.mxu0 %v5985_v45  ;;  %v6031_v45 = vld [vmem:[#allocation7 + $0x490] sm:$0xff]  ;;  %232 = vst [vmem:[#allocation1] ss:$2 sm:$0xff] %v4336_v47 }
  0x8a   :  { %3774 = vmatpush.bf16.msrb.mxu1 %v5993_v46  ;;  %v6039_v46 = vld [vmem:[#allocation7 + $0x4d0] sm:$0xff] }
  0x8b   :  { %3787 = vmatpush.bf16.msrb.mxu2 %v6001_v49  ;;  %v6022_v49 = vld [vmem:[#allocation7 + $0x448] sm:$0xff] }
  0x8c   :  { %3800 = vmatpush.bf16.msrb.mxu3 %v6009_v50  ;;  %v207_v50 = vpack.c.bf16 %v6556_v58, %v6554_v57  ;;  %v6068_v57 = vld [vmem:[#allocation7 + $0x5b8] sm:$0xff] }
  0x8d   :  { %3762 = vmatpush.bf16.msrb.mxu0 %v5984_v51  ;;  %v217_v51 = vpack.c.bf16 %v214_v31, %v213_v28  ;;  %v6076_v58 = vld [vmem:[#allocation7 + $0x5f8] sm:$0xff]  ;;  %v6063_v31 = vld [vmem:[#allocation7 + $0x590] sm:$0xff] }
  0x8e   :  { %3775 = vmatpush.bf16.msrb.mxu1 %v5992_v52  ;;  %v6030_v52 = vld [vmem:[#allocation7 + $0x488] sm:$0xff] }
  0x8f   :  { %3788 = vmatpush.bf16.msrb.mxu2 %v6000_v53  ;;  %v6038_v53 = vld [vmem:[#allocation7 + $0x4c8] sm:$0xff] }
  0x90   :  { %3801 = vmatpush.bf16.msrb.mxu3 %v6008_v54  ;;  %v6013_v54 = vld [vmem:[#allocation7 + $0x400] sm:$0xff] }
  0x91   :  { %3763 = vmatpush.bf16.msrb.mxu0 %v5983_v55  ;;  %v6021_v55 = vld [vmem:[#allocation7 + $0x440] sm:$0xff] }
  0x92   :  { %3776 = vmatpush.bf16.msrb.mxu1 %v5991_v56  ;;  %v415_v56 = vunpack.c.l.b16 %v207_v50 }
  0x93   :  { %3789 = vmatpush.bf16.msrb.mxu2 %v5999_v59  ;;  %v422_v59 = vunpack.c.l.b16 %v217_v51 }
  0x94   :  { %3802 = vmatpush.bf16.msrb.mxu3 %v6007_v60  ;;  %v6029_v60 = vld [vmem:[#allocation7 + $0x480] sm:$0xff] }
  0x95   :  { %3764 = vmatpush.bf16.msrb.mxu0 %v5982_v62  ;;  %v416_v62 = vunpack.c.h.b16 %v207_v50 }
  0x96   :  { %3777 = vmatpush.bf16.msrb.mxu1 %v5990_v63  ;;  %v423_v63 = vunpack.c.h.b16 %v217_v51 }
  0x97   :  { %3790 = vmatpush.bf16.msrb.mxu2 %v5998_v2  ;;  %v417_v2 = vpack.c.b16 %v415_v56, %v415_v56 }
  0x98   :  { %3803 = vmatpush.bf16.msrb.mxu3 %v6006_v3  ;;  %v424_v3 = vpack.c.b16 %v422_v59, %v422_v59  ;;  %v6100_v59 = vld [vmem:[#allocation7 + $0x6b8] sm:$0xff] }
  0x99   :  { %3765 = vmatpush.bf16.msrb.mxu0 %v5981_v4  ;;  %v418_v4 = vpack.c.b16 %v416_v62, %v416_v62 }
  0x9a   :  { %3778 = vmatpush.bf16.msrb.mxu1 %v5989_v5  ;;  %v425_v5 = vpack.c.b16 %v423_v63, %v423_v63 }
  0x9b   :  { %3791 = vmatpush.bf16.msrb.mxu2 %v5997_v8  ;;  %v6067_v8 = vld [vmem:[#allocation7 + $0x5b0] sm:$0xff] }
  0x9c   :  { %3804 = vmatpush.bf16.msrb.mxu3 %v6005_v9  ;;  %3766 = vmatmul.bf16.vlgmr.msrb.gmra.mxu0 %v403_v16  ;;  %v6075_v9 = vld [vmem:[#allocation7 + $0x5f0] sm:$0xff]  ;;  %v6057_v16 = vld [vmem:[#allocation7 + $0x560] sm:$0xff] }
  0x9d   :  { %3810 = vmatpush.bf16.msra.mxu0 %v6020_v12  ;;  %3779 = vmatmul.bf16.vlgmr.msrb.gmra.mxu1 %v404_v18  ;;  %v6066_v12 = vld [vmem:[#allocation7 + $0x5a8] sm:$0xff]  ;;  %v4337_v18 = vsel %vm238_vm13, 1.0, %v6473_v39 }
  0x9e   :  { %3823 = vmatpush.bf16.msra.mxu1 %v6028_v13  ;;  %3792 = vmatmul.bf16.vlgmr.msrb.gmra.mxu2 %v410_v17  ;;  %v6074_v13 = vld [vmem:[#allocation7 + $0x5e8] sm:$0xff]  ;;  %v234_v17 = vld.sshfl [vmem:[#allocation1 + $0x8] sm:$0xff pattern:$0x75316420] }
  0x9f   :  { %3836 = vmatpush.bf16.msra.mxu2 %v6036_v14  ;;  %3805 = vmatmul.bf16.vlgmr.msrb.gmra.mxu3 %v411_v19  ;;  %v233_v14 = vld.sshfl [vmem:[#allocation1] sm:$0xff pattern:$0x75316420]  ;;  %v6065_v19 = vld [vmem:[#allocation7 + $0x5a0] sm:$0xff] }
  0xa0   :  { %3849 = vmatpush.bf16.msra.mxu3 %v6044_v15  ;;  %v6049_v15 = vld [vmem:[#allocation7 + $0x520] sm:$0xff]  ;;  %242 = vst [vmem:[#allocation1] ss:$2 sm:$0xff] %v4337_v18 }
  0xa1   :  { %3811 = vmatpush.bf16.msra.mxu0 %v6019_v20  ;;  %v6073_v20 = vld [vmem:[#allocation7 + $0x5e0] sm:$0xff] }
  0xa2   :  { %3824 = vmatpush.bf16.msra.mxu1 %v6027_v21  ;;  %v6048_v21 = vld [vmem:[#allocation7 + $0x518] sm:$0xff] }
  0xa3   :  { %3837 = vmatpush.bf16.msra.mxu2 %v6035_v22  ;;  %v6056_v22 = vld [vmem:[#allocation7 + $0x558] sm:$0xff] }
  0xa4   :  { %3850 = vmatpush.bf16.msra.mxu3 %v6043_v23  ;;  %v6064_v23 = vld [vmem:[#allocation7 + $0x598] sm:$0xff] }
  0xa5   :  { %3812 = vmatpush.bf16.msra.mxu0 %v6018_v24  ;;  %v6072_v24 = vld [vmem:[#allocation7 + $0x5d8] sm:$0xff] }
  0xa6   :  { %3825 = vmatpush.bf16.msra.mxu1 %v6026_v25  ;;  %v6047_v25 = vld [vmem:[#allocation7 + $0x510] sm:$0xff] }
  0xa7   :  { %3838 = vmatpush.bf16.msra.mxu2 %v6034_v26  ;;  %v6055_v26 = vld [vmem:[#allocation7 + $0x550] sm:$0xff] }
  0xa8   :  { %3851 = vmatpush.bf16.msra.mxu3 %v6042_v27 }
  0xa9   :  { %3813 = vmatpush.bf16.msra.mxu0 %v6017_v29  ;;  %v6574_v29 = vld.sshfl [vmem:[#allocation1] sm:$0xff pattern:$0x75316420] }
  0xaa   :  { %3826 = vmatpush.bf16.msra.mxu1 %v6025_v30  ;;  %v6576_v30 = vld.sshfl [vmem:[#allocation1 + $0x8] sm:$0xff pattern:$0x75316420] }
  0xab   :  { %3839 = vmatpush.bf16.msra.mxu2 %v6033_v33  ;;  %v4338_v33 = vsel %vm248_vm14, 1.0, %v6473_v39 }
  0xac   :  { %3852 = vmatpush.bf16.msra.mxu3 %v6041_v35  ;;  %v6281_v35 = vld [vmem:[#allocation8] ss:$0 sm:$0xff]  ;;  %252 = vst [vmem:[#allocation1] ss:$2 sm:$0xff] %v4338_v33 }
  0xad   :  { %3814 = vmatpush.bf16.msra.mxu0 %v6016_v36  ;;  %v6046_v36 = vld [vmem:[#allocation7 + $0x508] sm:$0xff] }
  0xae   :  { %3827 = vmatpush.bf16.msra.mxu1 %v6024_v37  ;;  %v6054_v37 = vld [vmem:[#allocation7 + $0x548] sm:$0xff] }
  0xaf   :  { %3840 = vmatpush.bf16.msra.mxu2 %v6032_v38  ;;  %v227_v38 = vpack.c.bf16 %v6566_v44, %v6564_v43  ;;  %v6084_v44 = vld [vmem:[#allocation7 + $0x638] sm:$0xff] }
  0xb0   :  { %3853 = vmatpush.bf16.msra.mxu3 %v6040_v40  ;;  %v237_v40 = vpack.c.bf16 %v234_v17, %v233_v14  ;;  %v6081_v14 = vld [vmem:[#allocation7 + $0x620] sm:$0xff] }
  0xb1   :  { %3815 = vmatpush.bf16.msra.mxu0 %v6015_v41  ;;  %v6062_v41 = vld [vmem:[#allocation7 + $0x588] sm:$0xff]  ;;  %v429_v50 = vunpack.c.l.b16 %v227_v38 }
  0xb2   :  { %3828 = vmatpush.bf16.msra.mxu1 %v6023_v42  ;;  %v6070_v42 = vld [vmem:[#allocation7 + $0x5c8] sm:$0xff]  ;;  %v436_v51 = vunpack.c.l.b16 %v237_v40  ;;  %v437_v43 = vunpack.c.h.b16 %v237_v40 }
  0xb3   :  { %3841 = vmatpush.bf16.msra.mxu2 %v6031_v45  ;;  %v254_v18 = vld.sshfl [vmem:[#allocation1 + $0x8] sm:$0xff pattern:$0x75316420] }
  0xb4   :  { %3854 = vmatpush.bf16.msra.mxu3 %v6039_v46  ;;  %v438_v62 = vpack.c.b16 %v436_v51, %v436_v51  ;;  %v6094_v51 = vld [vmem:[#allocation7 + $0x688] sm:$0xff] }
  0xb5   :  { %3816 = vmatpush.bf16.msra.mxu0 %v6014_v48  ;;  %v6045_v48 = vld [vmem:[#allocation7 + $0x500] sm:$0xff] }
  0xb6   :  { %3829 = vmatpush.bf16.msra.mxu1 %v6022_v49  ;;  %v6053_v49 = vld [vmem:[#allocation7 + $0x540] sm:$0xff] }
  0xb7   :  { %3842 = vmatpush.bf16.msra.mxu2 %v6030_v52  ;;  %v6061_v52 = vld [vmem:[#allocation7 + $0x580] sm:$0xff] }
  0xb8   :  { %3855 = vmatpush.bf16.msra.mxu3 %v6038_v53  ;;  %v6069_v53 = vld [vmem:[#allocation7 + $0x5c0] sm:$0xff] }
  0xb9   :  { %3817 = vmatpush.bf16.msra.mxu0 %v6013_v54  ;;  %v3611_v27 = vpop.f32.mrf.mxu0  ;;  %v430_v54 = vunpack.c.h.b16 %v227_v38  ;;  %v6103_v38 = vld [vmem:[#allocation7 + $0x6d0] sm:$0xff] }
  0xba   :  { %3830 = vmatpush.bf16.msra.mxu1 %v6021_v55  ;;  %v3624_v28 = vpop.f32.mrf.mxu1  ;;  %v3612_v45 = vadd.f32 %v6281_v35, %v3611_v27  ;;  %v6092_v55 = vld [vmem:[#allocation7 + $0x678] sm:$0xff] }
  0xbb   :  { %3843 = vmatpush.bf16.msra.mxu2 %v6029_v60  ;;  %v6108_v60 = vld [vmem:[#allocation7 + $0x6f8] sm:$0xff]  ;;  %v432_v63 = vpack.c.b16 %v430_v54, %v430_v54  ;;  %v6085_v54 = vld [vmem:[#allocation7 + $0x640] sm:$0xff] }
  0xbc   :  { %3856 = vmatpush.bf16.msra.mxu3 %v6037_v61  ;;  %3818 = vmatmul.bf16.vlgmr.msra.gmra.mxu0 %v417_v2  ;;  %v3625_v56 = vadd.f32 %v3624_v28, %v3612_v45  ;;  %v431_v61 = vpack.c.b16 %v429_v50, %v429_v50  ;;  %v6091_v2 = vld [vmem:[#allocation7 + $0x670] sm:$0xff]  ;;  %v6104_v27 = vld [vmem:[#allocation7 + $0x6d8] sm:$0xff] }
  0xbd   :  { %3862 = vmatpush.bf16.msrb.mxu0 %v6052_v0  ;;  %3831 = vmatmul.bf16.vlgmr.msra.gmra.mxu1 %v418_v4  ;;  %v439_v0 = vpack.c.b16 %v437_v43, %v437_v43  ;;  %v6099_v4 = vld [vmem:[#allocation7 + $0x6b0] sm:$0xff] }
  0xbe   :  { %3875 = vmatpush.bf16.msrb.mxu1 %v6060_v1  ;;  %3844 = vmatmul.bf16.vlgmr.msra.gmra.mxu2 %v424_v3  ;;  %v6079_v28 = vld [vmem:[#allocation7 + $0x610] sm:$0xff] }
  0xbf   :  { %3888 = vmatpush.bf16.msrb.mxu2 %v6068_v57  ;;  %3857 = vmatmul.bf16.vlgmr.msra.gmra.mxu3 %v425_v5  ;;  %v6107_v5 = vld [vmem:[#allocation7 + $0x6f0] sm:$0xff] }
  0xc0   :  { %3901 = vmatpush.bf16.msrb.mxu3 %v6076_v58  ;;  %v6083_v58 = vld [vmem:[#allocation7 + $0x630] sm:$0xff] }
  0xc1   :  { %3863 = vmatpush.bf16.msrb.mxu0 %v6051_v6  ;;  %v3613_v46 = vpop.f32.mrf.mxu0 }
  0xc2   :  { %3876 = vmatpush.bf16.msrb.mxu1 %v6059_v7  ;;  %v3626_v47 = vpop.f32.mrf.mxu1  ;;  %v6082_v7 = vld [vmem:[#allocation7 + $0x628] sm:$0xff] }
  0xc3   :  { %3889 = vmatpush.bf16.msrb.mxu2 %v6067_v8  ;;  %v6090_v8 = vld [vmem:[#allocation7 + $0x668] sm:$0xff] }
  0xc4   :  { %3902 = vmatpush.bf16.msrb.mxu3 %v6075_v9  ;;  %v6098_v9 = vld [vmem:[#allocation7 + $0x6a8] sm:$0xff] }
  0xc5   :  { %3864 = vmatpush.bf16.msrb.mxu0 %v6050_v10  ;;  %v6106_v10 = vld [vmem:[#allocation7 + $0x6e8] sm:$0xff] }
  0xc6   :  { %3877 = vmatpush.bf16.msrb.mxu1 %v6058_v11  ;;  %v6078_v46 = vld [vmem:[#allocation7 + $0x608] sm:$0xff] }
  0xc7   :  { %3890 = vmatpush.bf16.msrb.mxu2 %v6066_v12  ;;  %v3637_v1 = vpop.f32.mrf.mxu2  ;;  %v6086_v47 = vld [vmem:[#allocation7 + $0x648] sm:$0xff] }
  0xc8   :  { %3903 = vmatpush.bf16.msrb.mxu3 %v6074_v13  ;;  %v3650_v57 = vpop.f32.mrf.mxu3  ;;  %v3638_v3 = vadd.f32 %v3637_v1, %v3625_v56  ;;  %v253_v13 = vld.sshfl [vmem:[#allocation1] sm:$0xff pattern:$0x75316420]  ;;  %v6101_v56 = vld [vmem:[#allocation7 + $0x6c0] sm:$0xff] }
  0xc9   :  { %3865 = vmatpush.bf16.msrb.mxu0 %v6049_v15  ;;  %v6089_v15 = vld [vmem:[#allocation7 + $0x660] sm:$0xff]  ;;  %v257_v50 = vpack.c.bf16 %v254_v18, %v253_v13  ;;  %v4341_v18 = vsel %vm278_vm2, 1.0, %v6473_v39 }
  0xca   :  { %3878 = vmatpush.bf16.msrb.mxu1 %v6057_v16  ;;  %v3651_v6 = vadd.f32 %v3650_v57, %v3638_v3  ;;  %v6115_v3 = vld [vmem:[#allocation7 + $0x730] sm:$0xff] }
  0xcb   :  { %3891 = vmatpush.bf16.msrb.mxu2 %v6065_v19  ;;  %v4339_v19 = vsel %vm258_vm15, 1.0, %v6473_v39 }
  0xcc   :  { %3904 = vmatpush.bf16.msrb.mxu3 %v6073_v20  ;;  %v6097_v20 = vld [vmem:[#allocation7 + $0x6a0] sm:$0xff]  ;;  %262 = vst [vmem:[#allocation1] ss:$2 sm:$0xff] %v4339_v19 }
  0xcd   :  { %3866 = vmatpush.bf16.msrb.mxu0 %v6048_v21  ;;  %v6105_v21 = vld [vmem:[#allocation7 + $0x6e0] sm:$0xff] }
  0xce   :  { %3879 = vmatpush.bf16.msrb.mxu1 %v6056_v22  ;;  %v6129_v19 = vld [vmem:[#allocation7 + $0x7a0] sm:$0xff] }
  0xcf   :  { %3892 = vmatpush.bf16.msrb.mxu2 %v6064_v23  ;;  %v3639_v11 = vpop.f32.mrf.mxu2 }
  0xd0   :  { %3905 = vmatpush.bf16.msrb.mxu3 %v6072_v24  ;;  %v3652_v12 = vpop.f32.mrf.mxu3  ;;  %v6080_v24 = vld [vmem:[#allocation7 + $0x618] sm:$0xff] }
  0xd1   :  { %3867 = vmatpush.bf16.msrb.mxu0 %v6047_v25  ;;  %v6088_v25 = vld [vmem:[#allocation7 + $0x658] sm:$0xff] }
  0xd2   :  { %3880 = vmatpush.bf16.msrb.mxu1 %v6055_v26  ;;  %v6096_v26 = vld [vmem:[#allocation7 + $0x698] sm:$0xff] }
  0xd3   :  { %3893 = vmatpush.bf16.msrb.mxu2 %v6063_v31  ;;  %v6087_v31 = vld [vmem:[#allocation7 + $0x650] sm:$0xff] }
  0xd4   :  { %3906 = vmatpush.bf16.msrb.mxu3 %v6071_v32  ;;  %v6584_v35 = vld.sshfl [vmem:[#allocation1] sm:$0xff pattern:$0x75316420] }
  0xd5   :  { %3868 = vmatpush.bf16.msrb.mxu0 %v6046_v36  ;;  %v6586_v36 = vld.sshfl [vmem:[#allocation1 + $0x8] sm:$0xff pattern:$0x75316420] }
  0xd6   :  { %3881 = vmatpush.bf16.msrb.mxu1 %v6054_v37  ;;  %v6095_v37 = vld [vmem:[#allocation7 + $0x690] sm:$0xff] }
  0xd7   :  { %3894 = vmatpush.bf16.msrb.mxu2 %v6062_v41 }
  0xd8   :  { %3907 = vmatpush.bf16.msrb.mxu3 %v6070_v42  ;;  %v4340_v42 = vsel %vm268_vm1, 1.0, %v6473_v39 }
  0xd9   :  { %3869 = vmatpush.bf16.msrb.mxu0 %v6045_v48  ;;  %v3663_v16 = vpop.f32.mrf.mxu0  ;;  %272 = vst [vmem:[#allocation1] ss:$2 sm:$0xff] %v4340_v42  ;;  %v6127_v42 = vld [vmem:[#allocation7 + $0x790] sm:$0xff] }
  0xda   :  { %3882 = vmatpush.bf16.msrb.mxu1 %v6053_v49  ;;  %v3676_v17 = vpop.f32.mrf.mxu1  ;;  %v3664_v22 = vadd.f32 %v3663_v16, %v3651_v6  ;;  %v247_v49 = vpack.c.bf16 %v6576_v30, %v6574_v29  ;;  %v6116_v29 = vld [vmem:[#allocation7 + $0x738] sm:$0xff]  ;;  %v6139_v6 = vld [vmem:[#allocation7 + $0x7f0] sm:$0xff] }
  0xdb   :  { %3895 = vmatpush.bf16.msrb.mxu2 %v6061_v52  ;;  %v6102_v52 = vld [vmem:[#allocation7 + $0x6c8] sm:$0xff]  ;;  %v6124_v30 = vld [vmem:[#allocation7 + $0x778] sm:$0xff] }
  0xdc   :  { %3908 = vmatpush.bf16.msrb.mxu3 %v6069_v53  ;;  %3870 = vmatmul.bf16.vlgmr.msrb.gmra.mxu0 %v431_v61  ;;  %v3677_v23 = vadd.f32 %v3676_v17, %v3664_v22  ;;  %v6077_v53 = vld [vmem:[#allocation7 + $0x600] sm:$0xff]  ;;  %v443_v43 = vunpack.c.l.b16 %v247_v49  ;;  %v6112_v22 = vld [vmem:[#allocation7 + $0x718] sm:$0xff] }
  0xdd   :  { %3914 = vmatpush.bf16.msra.mxu0 %v6084_v44  ;;  %3883 = vmatmul.bf16.vlgmr.msrb.gmra.mxu1 %v432_v63  ;;  %v450_v44 = vunpack.c.l.b16 %v257_v50  ;;  %v6132_v63 = vld [vmem:[#allocation7 + $0x7b8] sm:$0xff] }
  0xde   :  { %3927 = vmatpush.bf16.msra.mxu1 %v6092_v55  ;;  %3896 = vmatmul.bf16.vlgmr.msrb.gmra.mxu2 %v438_v62  ;;  %v6093_v55 = vld [vmem:[#allocation7 + $0x680] sm:$0xff]  ;;  %v445_v1 = vpack.c.b16 %v443_v43, %v443_v43 }
  0xdf   :  { %3940 = vmatpush.bf16.msra.mxu2 %v6100_v59  ;;  %3909 = vmatmul.bf16.vlgmr.msrb.gmra.mxu3 %v439_v0  ;;  %v444_v59 = vunpack.c.h.b16 %v247_v49  ;;  %v6140_v0 = vld [vmem:[#allocation7 + $0x7f8] sm:$0xff]  ;;  %v452_v57 = vpack.c.b16 %v450_v44, %v450_v44  ;;  %v267_v49 = vpack.c.bf16 %v6586_v36, %v6584_v35  ;;  %v6109_v43 = vld [vmem:[#allocation7 + $0x700] sm:$0xff] }
  0xe0   :  { %3953 = vmatpush.bf16.msra.mxu3 %v6108_v60  ;;  %v451_v60 = vunpack.c.h.b16 %v257_v50  ;;  %v273_v12 = vld.sshfl [vmem:[#allocation1] sm:$0xff pattern:$0x75316420]  ;;  %v274_v17 = vld.sshfl [vmem:[#allocation1 + $0x8] sm:$0xff pattern:$0x75316420] }
  0xe1   :  { %3915 = vmatpush.bf16.msra.mxu0 %v6083_v58  ;;  %v3665_v32 = vpop.f32.mrf.mxu0  ;;  %v3689_v40 = vpop.f32.mrf.mxu2  ;;  %v446_v58 = vpack.c.b16 %v444_v59, %v444_v59  ;;  %282 = vst [vmem:[#allocation1] ss:$2 sm:$0xff] %v4341_v18  ;;  %v277_v50 = vpack.c.bf16 %v274_v17, %v273_v12  ;;  %v6117_v44 = vld [vmem:[#allocation7 + $0x740] sm:$0xff]  ;;  %v6148_v35 = vld [vmem:[#allocation7 + $0x838] sm:$0xff] }
  0xe2   :  { %3928 = vmatpush.bf16.msra.mxu1 %v6091_v2  ;;  %v3678_v33 = vpop.f32.mrf.mxu1  ;;  %v3702_v41 = vpop.f32.mrf.mxu3  ;;  %v3690_v45 = vadd.f32 %v3689_v40, %v3677_v23  ;;  %v453_v2 = vpack.c.b16 %v451_v60, %v451_v60  ;;  %v6120_v23 = vld [vmem:[#allocation7 + $0x758] sm:$0xff]  ;;  %v6119_v32 = vld [vmem:[#allocation7 + $0x750] sm:$0xff]  ;;  %v6125_v59 = vld [vmem:[#allocation7 + $0x780] sm:$0xff] }
  0xe3   :  { %3941 = vmatpush.bf16.msra.mxu2 %v6099_v4  ;;  %v6123_v4 = vld [vmem:[#allocation7 + $0x770] sm:$0xff]  ;;  %v6133_v60 = vld [vmem:[#allocation7 + $0x7c0] sm:$0xff]  ;;  %v6156_v36 = vld [vmem:[#allocation7 + $0x878] sm:$0xff] }
  0xe4   :  { %3954 = vmatpush.bf16.msra.mxu3 %v6107_v5  ;;  %v3703_v48 = vadd.f32 %v3702_v41, %v3690_v45  ;;  %v6131_v5 = vld [vmem:[#allocation7 + $0x7b0] sm:$0xff]  ;;  %v6145_v12 = vld [vmem:[#allocation7 + $0x820] sm:$0xff] }
  0xe5   :  { %3916 = vmatpush.bf16.msra.mxu0 %v6082_v7  ;;  %v6114_v7 = vld [vmem:[#allocation7 + $0x728] sm:$0xff]  ;;  %v6135_v45 = vld [vmem:[#allocation7 + $0x7d0] sm:$0xff]  ;;  %v6161_v17 = vld [vmem:[#allocation7 + $0x8a0] sm:$0xff] }
  0xe6   :  { %3929 = vmatpush.bf16.msra.mxu1 %v6090_v8  ;;  %v6122_v8 = vld [vmem:[#allocation7 + $0x768] sm:$0xff]  ;;  %v6169_v18 = vld [vmem:[#allocation7 + $0x8e0] sm:$0xff] }
  0xe7   :  { %3942 = vmatpush.bf16.msra.mxu2 %v6098_v9  ;;  %v6130_v9 = vld [vmem:[#allocation7 + $0x7a8] sm:$0xff] }
  0xe8   :  { %3955 = vmatpush.bf16.msra.mxu3 %v6106_v10  ;;  %v6138_v10 = vld [vmem:[#allocation7 + $0x7e8] sm:$0xff]  ;;  %v6598_v41 = vld.sshfl [vmem:[#allocation1 + $0x8] sm:$0xff pattern:$0x75316420] }
  0xe9   :  { %3917 = vmatpush.bf16.msra.mxu0 %v6081_v14  ;;  %v3691_v61 = vpop.f32.mrf.mxu2  ;;  %v6113_v14 = vld [vmem:[#allocation7 + $0x720] sm:$0xff]  ;;  %v6596_v40 = vld.sshfl [vmem:[#allocation1] sm:$0xff pattern:$0x75316420] }
  0xea   :  { %3930 = vmatpush.bf16.msra.mxu1 %v6089_v15  ;;  %v3704_v62 = vpop.f32.mrf.mxu3  ;;  %v6121_v15 = vld [vmem:[#allocation7 + $0x760] sm:$0xff]  ;;  %v458_v61 = vunpack.c.h.b16 %v267_v49 }
  0xeb   :  { %3943 = vmatpush.bf16.msra.mxu2 %v6097_v20  ;;  %v6137_v20 = vld [vmem:[#allocation7 + $0x7e0] sm:$0xff]  ;;  %v465_v62 = vunpack.c.h.b16 %v277_v50 }
  0xec   :  { %3956 = vmatpush.bf16.msra.mxu3 %v6105_v21 }
  0xed   :  { %3918 = vmatpush.bf16.msra.mxu0 %v6080_v24  ;;  %v6128_v24 = vld [vmem:[#allocation7 + $0x798] sm:$0xff] }
  0xee   :  { %3931 = vmatpush.bf16.msra.mxu1 %v6088_v25  ;;  %v6136_v25 = vld [vmem:[#allocation7 + $0x7d8] sm:$0xff] }
  0xef   :  { %3944 = vmatpush.bf16.msra.mxu2 %v6096_v26 }
  0xf0   :  { %3957 = vmatpush.bf16.msra.mxu3 %v6104_v27 }
  0xf1   :  { %3919 = vmatpush.bf16.msra.mxu0 %v6079_v28 }
  0xf2   :  { %3932 = vmatpush.bf16.msra.mxu1 %v6087_v31  ;;  %v6111_v31 = vld [vmem:[#allocation7 + $0x710] sm:$0xff] }
  0xf3   :  { %3945 = vmatpush.bf16.msra.mxu2 %v6095_v37 }
  0xf4   :  { %3958 = vmatpush.bf16.msra.mxu3 %v6103_v38 }
  0xf5   :  { %3920 = vmatpush.bf16.msra.mxu0 %v6078_v46  ;;  %v4342_v46 = vsel %vm288_vm3, 1.0, %v6473_v39 }
  0xf6   :  { %3933 = vmatpush.bf16.msra.mxu1 %v6086_v47  ;;  %292 = vst [vmem:[#allocation1] ss:$2 sm:$0xff] %v4342_v46  ;;  %v6110_v47 = vld [vmem:[#allocation7 + $0x708] sm:$0xff]  ;;  %v6167_v46 = vld [vmem:[#allocation7 + $0x8d0] sm:$0xff] }
  0xf7   :  { %3946 = vmatpush.bf16.msra.mxu2 %v6094_v51  ;;  %v6126_v51 = vld [vmem:[#allocation7 + $0x788] sm:$0xff] }
  0xf8   :  { %3959 = vmatpush.bf16.msra.mxu3 %v6102_v52  ;;  %v6134_v52 = vld [vmem:[#allocation7 + $0x7c8] sm:$0xff] }
  0xf9   :  { %3921 = vmatpush.bf16.msra.mxu0 %v6077_v53  ;;  %v3715_v11 = vpop.f32.mrf.mxu0 }
  0xfa   :  { %3934 = vmatpush.bf16.msra.mxu1 %v6085_v54  ;;  %v3716_v13 = vadd.f32 %v3715_v11, %v3703_v48  ;;  %v3728_v16 = vpop.f32.mrf.mxu1  ;;  %v6118_v48 = vld [vmem:[#allocation7 + $0x748] sm:$0xff] }
  0xfb   :  { %3947 = vmatpush.bf16.msra.mxu2 %v6093_v55  ;;  %v457_v55 = vunpack.c.l.b16 %v267_v49  ;;  %v287_v49 = vpack.c.bf16 %v6598_v41, %v6596_v40  ;;  %v6157_v40 = vld [vmem:[#allocation7 + $0x880] sm:$0xff] }
  0xfc   :  { %3960 = vmatpush.bf16.msra.mxu3 %v6101_v56  ;;  %3922 = vmatmul.bf16.vlgmr.msra.gmra.mxu0 %v445_v1  ;;  %v3729_v21 = vadd.f32 %v3728_v16, %v3716_v13  ;;  %v464_v56 = vunpack.c.l.b16 %v277_v50  ;;  %v460_v1 = vpack.c.b16 %v458_v61, %v458_v61  ;;  %v6153_v13 = vld [vmem:[#allocation7 + $0x860] sm:$0xff]  ;;  %v4343_v16 = vsel %vm298_vm4, 1.0, %v6473_v39 }
  0xfd   :  { %3966 = vmatpush.bf16.msrb.mxu0 %v6116_v29  ;;  %3935 = vmatmul.bf16.vlgmr.msra.gmra.mxu1 %v446_v58  ;;  %v6164_v29 = vld [vmem:[#allocation7 + $0x8b8] sm:$0xff]  ;;  %v6147_v58 = vld [vmem:[#allocation7 + $0x830] sm:$0xff]  ;;  %v6165_v41 = vld [vmem:[#allocation7 + $0x8c0] sm:$0xff] }
  0xfe   :  { %3979 = vmatpush.bf16.msrb.mxu1 %v6124_v30  ;;  %3948 = vmatmul.bf16.vlgmr.msra.gmra.mxu2 %v452_v57  ;;  %v6172_v30 = vld [vmem:[#allocation7 + $0x8f8] sm:$0xff]  ;;  %v467_v57 = vpack.c.b16 %v465_v62, %v465_v62  ;;  %v472_v62 = vunpack.c.h.b16 %v287_v49 }
  0xff   :  { %3992 = vmatpush.bf16.msrb.mxu2 %v6132_v63  ;;  %3961 = vmatmul.bf16.vlgmr.msra.gmra.mxu3 %v453_v2  ;;  %v459_v63 = vpack.c.b16 %v457_v55, %v457_v55  ;;  %v6155_v2 = vld [vmem:[#allocation7 + $0x870] sm:$0xff]  ;;  %v6149_v55 = vld [vmem:[#allocation7 + $0x840] sm:$0xff] }
 0x100   :  { %4005 = vmatpush.bf16.msrb.mxu3 %v6140_v0  ;;  %v466_v0 = vpack.c.b16 %v464_v56, %v464_v56  ;;  %v471_v56 = vunpack.c.l.b16 %v287_v49 }
 0x101   :  { %3967 = vmatpush.bf16.msrb.mxu0 %v6115_v3  ;;  %v3741_v26 = vpop.f32.mrf.mxu2  ;;  %v3717_v33 = vpop.f32.mrf.mxu0  ;;  %v6163_v3 = vld [vmem:[#allocation7 + $0x8b0] sm:$0xff] }
 0x102   :  { %3980 = vmatpush.bf16.msrb.mxu1 %v6123_v4  ;;  %v3742_v27 = vadd.f32 %v3741_v26, %v3729_v21  ;;  %v3754_v28 = vpop.f32.mrf.mxu3  ;;  %v3730_v38 = vpop.f32.mrf.mxu1  ;;  %v6171_v4 = vld [vmem:[#allocation7 + $0x8f0] sm:$0xff]  ;;  %v6152_v21 = vld [vmem:[#allocation7 + $0x858] sm:$0xff] }
 0x103   :  { %3993 = vmatpush.bf16.msrb.mxu2 %v6131_v5  ;;  %v6146_v5 = vld [vmem:[#allocation7 + $0x828] sm:$0xff] }
 0x104   :  { %4006 = vmatpush.bf16.msrb.mxu3 %v6139_v6  ;;  %v6594_v37 = vadd.f32 %v3754_v28, %v3742_v27  ;;  %v6154_v6 = vld [vmem:[#allocation7 + $0x868] sm:$0xff]  ;;  %v6143_v28 = vld [vmem:[#allocation7 + $0x810] sm:$0xff] }
 0x105   :  { %3968 = vmatpush.bf16.msrb.mxu0 %v6114_v7  ;;  %v6162_v7 = vld [vmem:[#allocation7 + $0x8a8] sm:$0xff] }
 0x106   :  { %3981 = vmatpush.bf16.msrb.mxu1 %v6122_v8  ;;  %v6170_v8 = vld [vmem:[#allocation7 + $0x8e8] sm:$0xff] }
 0x107   :  { %3994 = vmatpush.bf16.msrb.mxu2 %v6130_v9 }
 0x108   :  { %4007 = vmatpush.bf16.msrb.mxu3 %v6138_v10  ;;  %v293_v10 = vld.sshfl [vmem:[#allocation1] sm:$0xff pattern:$0x75316420] }
 0x109   :  { %3969 = vmatpush.bf16.msrb.mxu0 %v6113_v14  ;;  %v3743_v53 = vpop.f32.mrf.mxu2 }
 0x10a   :  { %3982 = vmatpush.bf16.msrb.mxu1 %v6121_v15  ;;  %v3756_v54 = vpop.f32.mrf.mxu3  ;;  %v294_v15 = vld.sshfl [vmem:[#allocation1 + $0x8] sm:$0xff pattern:$0x75316420] }
 0x10b   :  { %3995 = vmatpush.bf16.msrb.mxu2 %v6129_v19  ;;  %302 = vst [vmem:[#allocation1] ss:$2 sm:$0xff] %v4343_v16  ;;  %v297_v50 = vpack.c.bf16 %v294_v15, %v293_v10  ;;  %v4345_v54 = vsel %vm318_vm6, 1.0, %v6473_v39  ;;  %v6193_v15 = vld [vmem:[#allocation7 + $0x9a0] sm:$0xff] }
 0x10c   :  { %4008 = vmatpush.bf16.msrb.mxu3 %v6137_v20  ;;  %v6144_v20 = vld [vmem:[#allocation7 + $0x818] sm:$0xff]  ;;  %v6201_v16 = vld [vmem:[#allocation7 + $0x9e0] sm:$0xff] }
 0x10d   :  { %3970 = vmatpush.bf16.msrb.mxu0 %v6112_v22  ;;  %v6160_v22 = vld [vmem:[#allocation7 + $0x898] sm:$0xff] }
 0x10e   :  { %3983 = vmatpush.bf16.msrb.mxu1 %v6120_v23  ;;  %v6168_v23 = vld [vmem:[#allocation7 + $0x8d8] sm:$0xff] }
 0x10f   :  { %3996 = vmatpush.bf16.msrb.mxu2 %v6128_v24 }
 0x110   :  { %4009 = vmatpush.bf16.msrb.mxu3 %v6136_v25  ;;  %v4344_v25 = vsel %vm308_vm5, 1.0, %v6473_v39 }
 0x111   :  { %3971 = vmatpush.bf16.msrb.mxu0 %v6111_v31  ;;  %v6151_v31 = vld [vmem:[#allocation7 + $0x850] sm:$0xff] }
 0x112   :  { %3984 = vmatpush.bf16.msrb.mxu1 %v6119_v32  ;;  %v6610_v38 = vld.sshfl [vmem:[#allocation1] sm:$0xff pattern:$0x75316420] }
 0x113   :  { %3997 = vmatpush.bf16.msrb.mxu2 %v6127_v42  ;;  %v6612_v42 = vld.sshfl [vmem:[#allocation1 + $0x8] sm:$0xff pattern:$0x75316420] }
 0x114   :  { %4010 = vmatpush.bf16.msrb.mxu3 %v6135_v45  ;;  %v6159_v45 = vld [vmem:[#allocation7 + $0x890] sm:$0xff]  ;;  %312 = vst [vmem:[#allocation1] ss:$2 sm:$0xff] %v4344_v25  ;;  %v307_v49 = vpack.c.bf16 %v6612_v42, %v6610_v38  ;;  %v6189_v42 = vld [vmem:[#allocation7 + $0x980] sm:$0xff] }
 0x115   :  { %3972 = vmatpush.bf16.msrb.mxu0 %v6110_v47  ;;  %v6142_v47 = vld [vmem:[#allocation7 + $0x808] sm:$0xff] }
 0x116   :  { %3985 = vmatpush.bf16.msrb.mxu1 %v6118_v48  ;;  %v6150_v48 = vld [vmem:[#allocation7 + $0x848] sm:$0xff] }
 0x117   :  { %3998 = vmatpush.bf16.msrb.mxu2 %v6126_v51  ;;  %v6158_v51 = vld [vmem:[#allocation7 + $0x888] sm:$0xff] }
 0x118   :  { %4011 = vmatpush.bf16.msrb.mxu3 %v6134_v52  ;;  %v6166_v52 = vld [vmem:[#allocation7 + $0x8c8] sm:$0xff] }
 0x119   :  { %3973 = vmatpush.bf16.msrb.mxu0 %v6109_v43  ;;  %v3767_v9 = vpop.f32.mrf.mxu0 }
 0x11a   :  { %3986 = vmatpush.bf16.msrb.mxu1 %v6117_v44  ;;  %v3768_v11 = vadd.f32 %v3767_v9, %v6594_v37  ;;  %v3780_v14 = vpop.f32.mrf.mxu1  ;;  %v6141_v44 = vld [vmem:[#allocation7 + $0x800] sm:$0xff]  ;;  %v6202_v9 = vld [vmem:[#allocation7 + $0x9e8] sm:$0xff] }
 0x11b   :  { %3999 = vmatpush.bf16.msrb.mxu2 %v6125_v59  ;;  %v478_v59 = vunpack.c.l.b16 %v297_v50  ;;  %v6620_v61 = vld.sshfl [vmem:[#allocation1 + $0x8] sm:$0xff pattern:$0x75316420] }
 0x11c   :  { %4012 = vmatpush.bf16.msrb.mxu3 %v6133_v60  ;;  %3974 = vmatmul.bf16.vlgmr.msrb.gmra.mxu0 %v459_v63  ;;  %v3781_v19 = vadd.f32 %v3780_v14, %v3768_v11  ;;  %v6618_v60 = vld.sshfl [vmem:[#allocation1] sm:$0xff pattern:$0x75316420]  ;;  %v6204_v63 = vld [vmem:[#allocation7 + $0x9f8] sm:$0xff] }
 0x11d   :  { %4018 = vmatpush.bf16.msra.mxu0 %v6148_v35  ;;  %3987 = vmatmul.bf16.vlgmr.msrb.gmra.mxu1 %v460_v1  ;;  %v479_v35 = vunpack.c.h.b16 %v297_v50  ;;  %322 = vst [vmem:[#allocation1] ss:$2 sm:$0xff] %v4345_v54  ;;  %v480_v1 = vpack.c.b16 %v478_v59, %v478_v59  ;;  %v317_v50 = vpack.c.bf16 %v6620_v61, %v6618_v60  ;;  %v4347_v54 = vsel %vm338_vm8, 1.0, %v6473_v39  ;;  %v6197_v60 = vld [vmem:[#allocation7 + $0x9c0] sm:$0xff] }
 0x11e   :  { %4031 = vmatpush.bf16.msra.mxu1 %v6156_v36  ;;  %4000 = vmatmul.bf16.vlgmr.msrb.gmra.mxu2 %v466_v0  ;;  %v6180_v36 = vld [vmem:[#allocation7 + $0x938] sm:$0xff]  ;;  %v473_v0 = vpack.c.b16 %v471_v56, %v471_v56  ;;  %v485_v56 = vunpack.c.l.b16 %v307_v49  ;;  %v486_v61 = vunpack.c.h.b16 %v307_v49  ;;  %v6222_v49 = vld [vmem:[#allocation7 + $0xa88] sm:$0xff] }
 0x11f   :  { %4044 = vmatpush.bf16.msra.mxu2 %v6164_v29  ;;  %4013 = vmatmul.bf16.vlgmr.msrb.gmra.mxu3 %v467_v57  ;;  %v6188_v29 = vld [vmem:[#allocation7 + $0x978] sm:$0xff]  ;;  %v474_v57 = vpack.c.b16 %v472_v62, %v472_v62  ;;  %v492_v59 = vunpack.c.l.b16 %v317_v50 }
 0x120   :  { %4057 = vmatpush.bf16.msra.mxu3 %v6172_v30  ;;  %v6196_v30 = vld [vmem:[#allocation7 + $0x9b8] sm:$0xff] }
 0x121   :  { %4019 = vmatpush.bf16.msra.mxu0 %v6147_v58  ;;  %v3793_v24 = vpop.f32.mrf.mxu2  ;;  %v3769_v32 = vpop.f32.mrf.mxu0  ;;  %v481_v58 = vpack.c.b16 %v479_v35, %v479_v35  ;;  %v6212_v62 = vld [vmem:[#allocation7 + $0xa38] sm:$0xff] }
 0x122   :  { %4032 = vmatpush.bf16.msra.mxu1 %v6155_v2  ;;  %v3794_v26 = vadd.f32 %v3793_v24, %v3781_v19  ;;  %v3806_v27 = vpop.f32.mrf.mxu3  ;;  %v3782_v37 = vpop.f32.mrf.mxu1  ;;  %v6179_v2 = vld [vmem:[#allocation7 + $0x930] sm:$0xff]  ;;  %v6184_v19 = vld [vmem:[#allocation7 + $0x958] sm:$0xff] }
 0x123   :  { %4045 = vmatpush.bf16.msra.mxu2 %v6163_v3  ;;  %v6187_v3 = vld [vmem:[#allocation7 + $0x970] sm:$0xff]  ;;  %v6220_v35 = vld [vmem:[#allocation7 + $0xa78] sm:$0xff] }
 0x124   :  { %4058 = vmatpush.bf16.msra.mxu3 %v6171_v4  ;;  %v6608_v33 = vadd.f32 %v3806_v27, %v3794_v26  ;;  %v6195_v4 = vld [vmem:[#allocation7 + $0x9b0] sm:$0xff] }
 0x125   :  { %4020 = vmatpush.bf16.msra.mxu0 %v6146_v5  ;;  %v6203_v5 = vld [vmem:[#allocation7 + $0x9f0] sm:$0xff] }
 0x126   :  { %4033 = vmatpush.bf16.msra.mxu1 %v6154_v6  ;;  %v6178_v6 = vld [vmem:[#allocation7 + $0x928] sm:$0xff]  ;;  %v6175_v26 = vld [vmem:[#allocation7 + $0x910] sm:$0xff] }
 0x127   :  { %4046 = vmatpush.bf16.msra.mxu2 %v6162_v7  ;;  %v6186_v7 = vld [vmem:[#allocation7 + $0x968] sm:$0xff]  ;;  %v6183_v27 = vld [vmem:[#allocation7 + $0x950] sm:$0xff] }
 0x128   :  { %4059 = vmatpush.bf16.msra.mxu3 %v6170_v8  ;;  %v6194_v8 = vld [vmem:[#allocation7 + $0x9a8] sm:$0xff]  ;;  %v6629_v37 = vld.sshfl [vmem:[#allocation1 + $0x8] sm:$0xff pattern:$0x75316420] }
 0x129   :  { %4021 = vmatpush.bf16.msra.mxu0 %v6145_v12  ;;  %v3795_v53 = vpop.f32.mrf.mxu2  ;;  %v6177_v12 = vld [vmem:[#allocation7 + $0x920] sm:$0xff] }
 0x12a   :  { %4034 = vmatpush.bf16.msra.mxu1 %v6153_v13  ;;  %v3808_v43 = vpop.f32.mrf.mxu3  ;;  %v6185_v13 = vld [vmem:[#allocation7 + $0x960] sm:$0xff] }
 0x12b   :  { %4047 = vmatpush.bf16.msra.mxu2 %v6161_v17 }
 0x12c   :  { %4060 = vmatpush.bf16.msra.mxu3 %v6169_v18  ;;  %v6176_v18 = vld [vmem:[#allocation7 + $0x918] sm:$0xff] }
 0x12d   :  { %4022 = vmatpush.bf16.msra.mxu0 %v6144_v20  ;;  %v6192_v20 = vld [vmem:[#allocation7 + $0x998] sm:$0xff] }
 0x12e   :  { %4035 = vmatpush.bf16.msra.mxu1 %v6152_v21  ;;  %v6200_v21 = vld [vmem:[#allocation7 + $0x9d8] sm:$0xff] }
 0x12f   :  { %4048 = vmatpush.bf16.msra.mxu2 %v6160_v22 }
 0x130   :  { %4061 = vmatpush.bf16.msra.mxu3 %v6168_v23  ;;  %v4346_v23 = vsel %vm328_vm7, 1.0, %v6473_v39 }
 0x131   :  { %4023 = vmatpush.bf16.msra.mxu0 %v6143_v28 }
 0x132   :  { %4036 = vmatpush.bf16.msra.mxu1 %v6151_v31 }
 0x133   :  { %4049 = vmatpush.bf16.msra.mxu2 %v6159_v45  ;;  %v6191_v45 = vld [vmem:[#allocation7 + $0x990] sm:$0xff] }
 0x134   :  { %4062 = vmatpush.bf16.msra.mxu3 %v6167_v46  ;;  %v6199_v46 = vld [vmem:[#allocation7 + $0x9d0] sm:$0xff] }
 0x135   :  { %4024 = vmatpush.bf16.msra.mxu0 %v6142_v47  ;;  %v6174_v47 = vld [vmem:[#allocation7 + $0x908] sm:$0xff] }
 0x136   :  { %4037 = vmatpush.bf16.msra.mxu1 %v6150_v48  ;;  %v6182_v48 = vld [vmem:[#allocation7 + $0x948] sm:$0xff] }
 0x137   :  { %4050 = vmatpush.bf16.msra.mxu2 %v6158_v51  ;;  %v6190_v51 = vld [vmem:[#allocation7 + $0x988] sm:$0xff] }
 0x138   :  { %4063 = vmatpush.bf16.msra.mxu3 %v6166_v52  ;;  %v6198_v52 = vld [vmem:[#allocation7 + $0x9c8] sm:$0xff] }
 0x139   :  { %4025 = vmatpush.bf16.msra.mxu0 %v6141_v44  ;;  %v3819_v10 = vpop.f32.mrf.mxu0  ;;  %v6173_v44 = vld [vmem:[#allocation7 + $0x900] sm:$0xff] }
 0x13a   :  { %4038 = vmatpush.bf16.msra.mxu1 %v6149_v55  ;;  %v3820_v11 = vadd.f32 %v3819_v10, %v6608_v33  ;;  %v3832_v14 = vpop.f32.mrf.mxu1  ;;  %v6627_v33 = vld.sshfl [vmem:[#allocation1] sm:$0xff pattern:$0x75316420]  ;;  %v6181_v55 = vld [vmem:[#allocation7 + $0x940] sm:$0xff] }
 0x13b   :  { %4051 = vmatpush.bf16.msra.mxu2 %v6157_v40  ;;  %332 = vst [vmem:[#allocation1] ss:$2 sm:$0xff] %v4346_v23  ;;  %v6209_v10 = vld [vmem:[#allocation7 + $0xa20] sm:$0xff] }
 0x13c   :  { %4064 = vmatpush.bf16.msra.mxu3 %v6165_v41  ;;  %4026 = vmatmul.bf16.vlgmr.msra.gmra.mxu0 %v473_v0  ;;  %v3833_v17 = vadd.f32 %v3832_v14, %v3820_v11  ;;  %v493_v41 = vunpack.c.h.b16 %v317_v50  ;;  %v488_v0 = vpack.c.b16 %v486_v61, %v486_v61  ;;  %v6217_v11 = vld [vmem:[#allocation7 + $0xa60] sm:$0xff]  ;;  %v6230_v50 = vld [vmem:[#allocation7 + $0xac8] sm:$0xff] }
 0x13d   :  { %4070 = vmatpush.bf16.msrb.mxu0 %v6180_v36  ;;  %4039 = vmatmul.bf16.vlgmr.msra.gmra.mxu1 %v474_v57  ;;  %v6228_v36 = vld [vmem:[#allocation7 + $0xab8] sm:$0xff]  ;;  %v6211_v57 = vld [vmem:[#allocation7 + $0xa30] sm:$0xff]  ;;  %v6233_v14 = vld [vmem:[#allocation7 + $0xae0] sm:$0xff] }
 0x13e   :  { %4083 = vmatpush.bf16.msrb.mxu1 %v6188_v29  ;;  %4052 = vmatmul.bf16.vlgmr.msra.gmra.mxu2 %v480_v1  ;;  %v6236_v29 = vld [vmem:[#allocation7 + $0xaf8] sm:$0xff]  ;;  %v495_v1 = vpack.c.b16 %v493_v41, %v493_v41 }
 0x13f   :  { %4096 = vmatpush.bf16.msrb.mxu2 %v6196_v30  ;;  %4065 = vmatmul.bf16.vlgmr.msra.gmra.mxu3 %v481_v58  ;;  %v487_v30 = vpack.c.b16 %v485_v56, %v485_v56  ;;  %v6219_v58 = vld [vmem:[#allocation7 + $0xa70] sm:$0xff]  ;;  %v6229_v56 = vld [vmem:[#allocation7 + $0xac0] sm:$0xff] }
 0x140   :  { %4109 = vmatpush.bf16.msrb.mxu3 %v6204_v63  ;;  %v494_v63 = vpack.c.b16 %v492_v59, %v492_v59  ;;  %v6244_v59 = vld [vmem:[#allocation7 + $0xb38] sm:$0xff] }
 0x141   :  { %4071 = vmatpush.bf16.msrb.mxu0 %v6179_v2  ;;  %v3845_v22 = vpop.f32.mrf.mxu2  ;;  %v3821_v28 = vpop.f32.mrf.mxu0  ;;  %v6227_v2 = vld [vmem:[#allocation7 + $0xab0] sm:$0xff] }
 0x142   :  { %4084 = vmatpush.bf16.msrb.mxu1 %v6187_v3  ;;  %v3846_v24 = vadd.f32 %v3845_v22, %v3833_v17  ;;  %v3858_v25 = vpop.f32.mrf.mxu3  ;;  %v3834_v32 = vpop.f32.mrf.mxu1  ;;  %v6637_v40 = vld.sshfl [vmem:[#allocation1] sm:$0xff pattern:$0x75316420]  ;;  %v6639_v38 = vld.sshfl [vmem:[#allocation1 + $0x8] sm:$0xff pattern:$0x75316420] }
 0x143   :  { %4097 = vmatpush.bf16.msrb.mxu2 %v6195_v4  ;;  %342 = vst [vmem:[#allocation1] ss:$2 sm:$0xff] %v4347_v54  ;;  %v6235_v3 = vld [vmem:[#allocation7 + $0xaf0] sm:$0xff]  ;;  %v6210_v4 = vld [vmem:[#allocation7 + $0xa28] sm:$0xff]  ;;  %v6216_v17 = vld [vmem:[#allocation7 + $0xa58] sm:$0xff] }
 0x144   :  { %4110 = vmatpush.bf16.msrb.mxu3 %v6203_v5  ;;  %v6625_v31 = vadd.f32 %v3858_v25, %v3846_v24  ;;  %v6218_v5 = vld [vmem:[#allocation7 + $0xa68] sm:$0xff]  ;;  %v6223_v32 = vld [vmem:[#allocation7 + $0xa90] sm:$0xff]  ;;  %v6213_v54 = vld [vmem:[#allocation7 + $0xa40] sm:$0xff] }
 0x145   :  { %4072 = vmatpush.bf16.msrb.mxu0 %v6178_v6  ;;  %v6226_v6 = vld [vmem:[#allocation7 + $0xaa8] sm:$0xff] }
 0x146   :  { %4085 = vmatpush.bf16.msrb.mxu1 %v6186_v7  ;;  %v6234_v7 = vld [vmem:[#allocation7 + $0xae8] sm:$0xff] }
 0x147   :  { %4098 = vmatpush.bf16.msrb.mxu2 %v6194_v8 }
 0x148   :  { %4111 = vmatpush.bf16.msrb.mxu3 %v6202_v9 }
 0x149   :  { %4073 = vmatpush.bf16.msrb.mxu0 %v6177_v12  ;;  %v3847_v53 = vpop.f32.mrf.mxu2 }
 0x14a   :  { %4086 = vmatpush.bf16.msrb.mxu1 %v6185_v13  ;;  %v3860_v43 = vpop.f32.mrf.mxu3  ;;  %v6225_v13 = vld [vmem:[#allocation7 + $0xaa0] sm:$0xff]  ;;  %v6644_v25 = vld.sshfl [vmem:[#allocation1] sm:$0xff pattern:$0x75316420] }
 0x14b   :  { %4099 = vmatpush.bf16.msrb.mxu2 %v6193_v15  ;;  %v6205_v53 = vld [vmem:[#allocation7 + $0xa00] sm:$0xff] }
 0x14c   :  { %4112 = vmatpush.bf16.msrb.mxu3 %v6201_v16  ;;  %v6208_v16 = vld [vmem:[#allocation7 + $0xa18] sm:$0xff] }
 0x14d   :  { %4074 = vmatpush.bf16.msrb.mxu0 %v6176_v18  ;;  %v6224_v18 = vld [vmem:[#allocation7 + $0xa98] sm:$0xff] }
 0x14e   :  { %4087 = vmatpush.bf16.msrb.mxu1 %v6184_v19  ;;  %v6232_v19 = vld [vmem:[#allocation7 + $0xad8] sm:$0xff] }
 0x14f   :  { %4100 = vmatpush.bf16.msrb.mxu2 %v6192_v20 }
 0x150   :  { %4113 = vmatpush.bf16.msrb.mxu3 %v6200_v21  ;;  %v4348_v21 = vsel %vm348_vm9, 1.0, %v6473_v39  ;;  %v6206_v39 = vld [vmem:[#allocation7 + $0xa08] sm:$0xff] }
 0x151   :  { %4075 = vmatpush.bf16.msrb.mxu0 %v6175_v26 }
 0x152   :  { %4088 = vmatpush.bf16.msrb.mxu1 %v6183_v27  ;;  %v6215_v27 = vld [vmem:[#allocation7 + $0xa50] sm:$0xff] }
 0x153   :  { %4101 = vmatpush.bf16.msrb.mxu2 %v6191_v45  ;;  %v6231_v45 = vld [vmem:[#allocation7 + $0xad0] sm:$0xff] }
 0x154   :  { %4114 = vmatpush.bf16.msrb.mxu3 %v6199_v46  ;;  %v6214_v46 = vld [vmem:[#allocation7 + $0xa48] sm:$0xff] }
 0x155   :  { %4076 = vmatpush.bf16.msrb.mxu0 %v6174_v47  ;;  %v327_v47 = vpack.c.bf16 %v6629_v37, %v6627_v33 }
 0x156   :  { %4089 = vmatpush.bf16.msrb.mxu1 %v6182_v48  ;;  %v337_v48 = vpack.c.bf16 %v6639_v38, %v6637_v40  ;;  %v6252_v40 = vld [vmem:[#allocation7 + $0xb78] sm:$0xff] }
 0x157   :  { %4102 = vmatpush.bf16.msrb.mxu2 %v6190_v51  ;;  %v499_v43 = vunpack.c.l.b16 %v327_v47  ;;  %v500_v33 = vunpack.c.h.b16 %v327_v47  ;;  %v6260_v38 = vld [vmem:[#allocation7 + $0xbb8] sm:$0xff] }
 0x158   :  { %4115 = vmatpush.bf16.msrb.mxu3 %v6198_v52  ;;  %v507_v37 = vunpack.c.h.b16 %v337_v48 }
 0x159   :  { %4077 = vmatpush.bf16.msrb.mxu0 %v6173_v44  ;;  %v3871_v8 = vpop.f32.mrf.mxu0  ;;  %v506_v44 = vunpack.c.l.b16 %v337_v48  ;;  %v502_v41 = vpack.c.b16 %v500_v33, %v500_v33 }
 0x15a   :  { %4090 = vmatpush.bf16.msrb.mxu1 %v6181_v55  ;;  %v3872_v9 = vadd.f32 %v3871_v8, %v6625_v31  ;;  %v3884_v12 = vpop.f32.mrf.mxu1  ;;  %v6648_v31 = vld.sshfl [vmem:[#allocation1 + $0x8] sm:$0xff pattern:$0x75316420]  ;;  %v6221_v55 = vld [vmem:[#allocation7 + $0xa80] sm:$0xff] }
 0x15b   :  { %4103 = vmatpush.bf16.msrb.mxu2 %v6189_v42  ;;  %352 = vst [vmem:[#allocation1] ss:$2 sm:$0xff] %v4348_v21  ;;  %v6268_v42 = vld [vmem:[#allocation7 + $0xbf8] sm:$0xff]  ;;  %v508_v61 = vpack.c.b16 %v506_v44, %v506_v44  ;;  %v6263_v21 = vld [vmem:[#allocation7 + $0xbd0] sm:$0xff] }
 0x15c   :  { %4116 = vmatpush.bf16.msrb.mxu3 %v6197_v60  ;;  %4078 = vmatmul.bf16.vlgmr.msrb.gmra.mxu0 %v487_v30  ;;  %v3885_v15 = vadd.f32 %v3884_v12, %v3872_v9  ;;  %v501_v60 = vpack.c.b16 %v499_v43, %v499_v43  ;;  %v6267_v30 = vld [vmem:[#allocation7 + $0xbf0] sm:$0xff]  ;;  %v6240_v9 = vld [vmem:[#allocation7 + $0xb18] sm:$0xff] }
 0x15d   :  { %4122 = vmatpush.bf16.msra.mxu0 %v6212_v62  ;;  %4091 = vmatmul.bf16.vlgmr.msrb.gmra.mxu1 %v488_v0  ;;  %v509_v62 = vpack.c.b16 %v507_v37, %v507_v37  ;;  %v6250_v0 = vld [vmem:[#allocation7 + $0xb68] sm:$0xff]  ;;  %v6264_v12 = vld [vmem:[#allocation7 + $0xbd8] sm:$0xff] }
 0x15e   :  { %4135 = vmatpush.bf16.msra.mxu1 %v6220_v35  ;;  %4104 = vmatmul.bf16.vlgmr.msrb.gmra.mxu2 %v494_v63  ;;  %v6243_v35 = vld [vmem:[#allocation7 + $0xb30] sm:$0xff]  ;;  %v6242_v63 = vld [vmem:[#allocation7 + $0xb28] sm:$0xff] }
 0x15f   :  { %4148 = vmatpush.bf16.msra.mxu2 %v6228_v36  ;;  %4117 = vmatmul.bf16.vlgmr.msrb.gmra.mxu3 %v495_v1  ;;  %v6251_v36 = vld [vmem:[#allocation7 + $0xb70] sm:$0xff]  ;;  %v6258_v1 = vld [vmem:[#allocation7 + $0xba8] sm:$0xff] }
 0x160   :  { %4161 = vmatpush.bf16.msra.mxu3 %v6236_v29  ;;  %v6259_v29 = vld [vmem:[#allocation7 + $0xbb0] sm:$0xff] }
 0x161   :  { %4123 = vmatpush.bf16.msra.mxu0 %v6211_v57  ;;  %v3897_v20 = vpop.f32.mrf.mxu2  ;;  %v3873_v24 = vpop.f32.mrf.mxu0  ;;  %v6266_v57 = vld [vmem:[#allocation7 + $0xbe8] sm:$0xff] }
 0x162   :  { %4136 = vmatpush.bf16.msra.mxu1 %v6219_v58  ;;  %v3898_v22 = vadd.f32 %v3897_v20, %v3885_v15  ;;  %v3910_v23 = vpop.f32.mrf.mxu3  ;;  %v3886_v28 = vpop.f32.mrf.mxu1  ;;  %v6255_v20 = vld [vmem:[#allocation7 + $0xb90] sm:$0xff] }
 0x163   :  { %4149 = vmatpush.bf16.msra.mxu2 %v6227_v2  ;;  %v354_v24 = vld.sshfl [vmem:[#allocation1 + $0x8] sm:$0xff pattern:$0x75316420] }
 0x164   :  { %4162 = vmatpush.bf16.msra.mxu3 %v6235_v3  ;;  %v6646_v26 = vadd.f32 %v3910_v23, %v3898_v22  ;;  %v6241_v3 = vld [vmem:[#allocation7 + $0xb20] sm:$0xff]  ;;  %v353_v23 = vld.sshfl [vmem:[#allocation1] sm:$0xff pattern:$0x75316420] }
 0x165   :  { %4124 = vmatpush.bf16.msra.mxu0 %v6210_v4  ;;  %v6249_v4 = vld [vmem:[#allocation7 + $0xb60] sm:$0xff]  ;;  %v357_v28 = vpack.c.bf16 %v354_v24, %v353_v23 }
 0x166   :  { %4137 = vmatpush.bf16.msra.mxu1 %v6218_v5 }
 0x167   :  { %4150 = vmatpush.bf16.msra.mxu2 %v6226_v6  ;;  %v6257_v6 = vld [vmem:[#allocation7 + $0xba0] sm:$0xff] }
 0x168   :  { %4163 = vmatpush.bf16.msra.mxu3 %v6234_v7  ;;  %v6265_v7 = vld [vmem:[#allocation7 + $0xbe0] sm:$0xff] }
 0x169   :  { %4125 = vmatpush.bf16.msra.mxu0 %v6209_v10  ;;  %v3899_v51 = vpop.f32.mrf.mxu2  ;;  %v6248_v10 = vld [vmem:[#allocation7 + $0xb58] sm:$0xff] }
 0x16a   :  { %4138 = vmatpush.bf16.msra.mxu1 %v6217_v11  ;;  %v3912_v52 = vpop.f32.mrf.mxu3  ;;  %v6256_v11 = vld [vmem:[#allocation7 + $0xb98] sm:$0xff]  ;;  %v520_v51 = vunpack.c.l.b16 %v357_v28 }
 0x16b   :  { %4151 = vmatpush.bf16.msra.mxu2 %v6225_v13  ;;  %v521_v52 = vunpack.c.h.b16 %v357_v28  ;;  %v4275_v28 = vld [vmem:[#allocation10 + $0x70] sm:$0xff] }
 0x16c   :  { %4164 = vmatpush.bf16.msra.mxu3 %v6233_v14  ;;  %v522_v43 = vpack.c.b16 %v520_v51, %v520_v51  ;;  %v4271_v51 = vld [vmem:[#allocation10 + $0x50] sm:$0xff] }
 0x16d   :  { %4126 = vmatpush.bf16.msra.mxu0 %v6208_v16  ;;  %v6239_v16 = vld [vmem:[#allocation7 + $0xb10] sm:$0xff]  ;;  %v523_v44 = vpack.c.b16 %v521_v52, %v521_v52 }
 0x16e   :  { %4139 = vmatpush.bf16.msra.mxu1 %v6216_v17  ;;  %v4270_v52 = vld [vmem:[#allocation10 + $0x48] sm:$0xff] }
 0x16f   :  { %4152 = vmatpush.bf16.msra.mxu2 %v6224_v18 }
 0x170   :  { %4165 = vmatpush.bf16.msra.mxu3 %v6232_v19  ;;  %v6247_v19 = vld [vmem:[#allocation7 + $0xb50] sm:$0xff] }
 0x171   :  { %4127 = vmatpush.bf16.msra.mxu0 %v6207_v34  ;;  %v6238_v34 = vld [vmem:[#allocation7 + $0xb08] sm:$0xff] }
 0x172   :  { %4140 = vmatpush.bf16.msra.mxu1 %v6215_v27  ;;  %v6246_v27 = vld [vmem:[#allocation7 + $0xb48] sm:$0xff] }
 0x173   :  { %4153 = vmatpush.bf16.msra.mxu2 %v6223_v32  ;;  %v6254_v32 = vld [vmem:[#allocation7 + $0xb88] sm:$0xff] }
 0x174   :  { %4166 = vmatpush.bf16.msra.mxu3 %v6231_v45  ;;  %v6262_v45 = vld [vmem:[#allocation7 + $0xbc8] sm:$0xff] }
 0x175   :  { %4128 = vmatpush.bf16.msra.mxu0 %v6206_v39 }
 0x176   :  { %4141 = vmatpush.bf16.msra.mxu1 %v6214_v46 }
 0x177   :  { %4154 = vmatpush.bf16.msra.mxu2 %v6222_v49  ;;  %v6237_v49 = vld [vmem:[#allocation7 + $0xb00] sm:$0xff] }
 0x178   :  { %4167 = vmatpush.bf16.msra.mxu3 %v6230_v50  ;;  %v6245_v50 = vld [vmem:[#allocation7 + $0xb40] sm:$0xff] }
 0x179   :  { %4129 = vmatpush.bf16.msra.mxu0 %v6205_v53  ;;  %v3923_v58 = vpop.f32.mrf.mxu0 }
 0x17a   :  { %4142 = vmatpush.bf16.msra.mxu1 %v6213_v54  ;;  %v3924_v2 = vadd.f32 %v3923_v58, %v6646_v26  ;;  %v3936_v5 = vpop.f32.mrf.mxu1  ;;  %v347_v26 = vpack.c.bf16 %v6648_v31, %v6644_v25  ;;  %v6253_v25 = vld [vmem:[#allocation7 + $0xb80] sm:$0xff] }
 0x17b   :  { %4155 = vmatpush.bf16.msra.mxu2 %v6221_v55  ;;  %v6261_v31 = vld [vmem:[#allocation7 + $0xbc0] sm:$0xff] }
 0x17c   :  { %4168 = vmatpush.bf16.msra.mxu3 %v6229_v56  ;;  %4130 = vmatmul.bf16.vlgmr.msra.gmra.mxu0 %v501_v60  ;;  %v3937_v8 = vadd.f32 %v3936_v5, %v3924_v2  ;;  %v513_v47 = vunpack.c.l.b16 %v347_v26  ;;  %v514_v48 = vunpack.c.h.b16 %v347_v26 }
 0x17d   :  { %4174 = vmatpush.bf16.msrb.mxu0 %v6244_v59  ;;  %4143 = vmatmul.bf16.vlgmr.msra.gmra.mxu1 %v502_v41 }
 0x17e   :  { %4187 = vmatpush.bf16.msrb.mxu1 %v6252_v40  ;;  %4156 = vmatmul.bf16.vlgmr.msra.gmra.mxu2 %v508_v61  ;;  %v515_v53 = vpack.c.b16 %v513_v47, %v513_v47  ;;  %v516_v54 = vpack.c.b16 %v514_v48, %v514_v48 }
 0x17f   :  { %4200 = vmatpush.bf16.msrb.mxu2 %v6260_v38  ;;  %4169 = vmatmul.bf16.vlgmr.msra.gmra.mxu3 %v509_v62 }
 0x180   :  { %4213 = vmatpush.bf16.msrb.mxu3 %v6268_v42 }
 0x181   :  { %4175 = vmatpush.bf16.msrb.mxu0 %v6243_v35  ;;  %v3949_v13 = vpop.f32.mrf.mxu2  ;;  %v3925_v17 = vpop.f32.mrf.mxu0 }
 0x182   :  { %4188 = vmatpush.bf16.msrb.mxu1 %v6251_v36  ;;  %v3950_v14 = vadd.f32 %v3949_v13, %v3937_v8  ;;  %v3962_v15 = vpop.f32.mrf.mxu3  ;;  %v3938_v22 = vpop.f32.mrf.mxu1 }
 0x183   :  { %4201 = vmatpush.bf16.msrb.mxu2 %v6259_v29 }
 0x184   :  { %4214 = vmatpush.bf16.msrb.mxu3 %v6267_v30  ;;  %v3963_v18 = vadd.f32 %v3962_v15, %v3950_v14 }
 0x185   :  { %4176 = vmatpush.bf16.msrb.mxu0 %v6242_v63 }
 0x186   :  { %4189 = vmatpush.bf16.msrb.mxu1 %v6250_v0 }
 0x187   :  { %4202 = vmatpush.bf16.msrb.mxu2 %v6258_v1 }
 0x188   :  { %4215 = vmatpush.bf16.msrb.mxu3 %v6266_v57 }
 0x189   :  { %4177 = vmatpush.bf16.msrb.mxu0 %v6241_v3  ;;  %v3951_v39 = vpop.f32.mrf.mxu2 }
 0x18a   :  { %4190 = vmatpush.bf16.msrb.mxu1 %v6249_v4  ;;  %v3964_v46 = vpop.f32.mrf.mxu3  ;;  %v4273_v39 = vld [vmem:[#allocation10 + $0x60] sm:$0xff] }
 0x18b   :  { %4203 = vmatpush.bf16.msrb.mxu2 %v6257_v6 }
 0x18c   :  { %4216 = vmatpush.bf16.msrb.mxu3 %v6265_v7 }
 0x18d   :  { %4178 = vmatpush.bf16.msrb.mxu0 %v6240_v9 }
 0x18e   :  { %4191 = vmatpush.bf16.msrb.mxu1 %v6248_v10 }
 0x18f   :  { %4204 = vmatpush.bf16.msrb.mxu2 %v6256_v11 }
 0x190   :  { %4217 = vmatpush.bf16.msrb.mxu3 %v6264_v12 }
 0x191   :  { %4179 = vmatpush.bf16.msrb.mxu0 %v6239_v16 }
 0x192   :  { %4192 = vmatpush.bf16.msrb.mxu1 %v6247_v19 }
 0x193   :  { %4205 = vmatpush.bf16.msrb.mxu2 %v6255_v20 }
 0x194   :  { %4218 = vmatpush.bf16.msrb.mxu3 %v6263_v21 }
 0x195   :  { %4180 = vmatpush.bf16.msrb.mxu0 %v6238_v34  ;;  %v4276_v34 = vld [vmem:[#allocation10 + $0x78] sm:$0xff] }
 0x196   :  { %4193 = vmatpush.bf16.msrb.mxu1 %v6246_v27 }
 0x197   :  { %4206 = vmatpush.bf16.msrb.mxu2 %v6254_v32 }
 0x198   :  { %4219 = vmatpush.bf16.msrb.mxu3 %v6262_v45  ;;  %v4274_v45 = vld [vmem:[#allocation10 + $0x68] sm:$0xff] }
 0x199   :  { %4181 = vmatpush.bf16.msrb.mxu0 %v6237_v49  ;;  %v3975_v55 = vpop.f32.mrf.mxu0  ;;  %v4272_v49 = vld [vmem:[#allocation10 + $0x58] sm:$0xff] }
 0x19a   :  { %4194 = vmatpush.bf16.msrb.mxu1 %v6245_v50  ;;  %v3976_v56 = vadd.f32 %v3975_v55, %v3963_v18  ;;  %v3988_v33 = vpop.f32.mrf.mxu1 }
 0x19b   :  { %4207 = vmatpush.bf16.msrb.mxu2 %v6253_v25 }
 0x19c   :  { %4220 = vmatpush.bf16.msrb.mxu3 %v6261_v31  ;;  %4182 = vmatmul.bf16.vlgmr.msrb.gmra.mxu0 %v515_v53  ;;  %v3989_v37 = vadd.f32 %v3988_v33, %v3976_v56  ;;  %v4269_v31 = vld [vmem:[#allocation10 + $0x40] sm:$0xff]  ;;  %v4268_v56 = vld [vmem:[#allocation10 + $0x38] sm:$0xff] }
 0x19d   :  { %4195 = vmatmul.bf16.vlgmr.msrb.gmra.mxu1 %v516_v54  ;;  %4281 = vmatpush.msra.mxu0 %v4276_v34 }
 0x19e   :  { %4208 = vmatmul.bf16.vlgmr.msrb.gmra.mxu2 %v522_v43 }
 0x19f   :  { %4221 = vmatmul.bf16.vlgmr.msrb.gmra.mxu3 %v523_v44  ;;  %4282 = vmatpush.msra.mxu0 %v4275_v28 }
 0x1a1   :  { %v4001_v59 = vpop.f32.mrf.mxu2  ;;  %v3977_v42 = vpop.f32.mrf.mxu0  ;;  %4283 = vmatpush.msra.mxu0 %v4274_v45 }
 0x1a2   :  { %v4002_v40 = vadd.f32 %v4001_v59, %v3989_v37  ;;  %v4014_v38 = vpop.f32.mrf.mxu3  ;;  %v3990_v61 = vpop.f32.mrf.mxu1  ;;  %v4267_v37 = vld [vmem:[#allocation10 + $0x30] sm:$0xff]  ;;  %v4265_v42 = vld [vmem:[#allocation10 + $0x20] sm:$0xff] }
 0x1a3   :  { %4284 = vmatpush.msra.mxu0 %v4273_v39 }
 0x1a4   :  { %v4015_v60 = vadd.f32 %v4014_v38, %v4002_v40  ;;  %v4266_v40 = vld [vmem:[#allocation10 + $0x28] sm:$0xff] }
 0x1a5   :  { %4285 = vmatpush.msra.mxu0 %v4272_v49 }
 0x1a7   :  { %4286 = vmatpush.msra.mxu0 %v4271_v51 }
 0x1a9   :  { %v4003_v41 = vpop.f32.mrf.mxu2  ;;  %4287 = vmatpush.msra.mxu0 %v4270_v52 }
 0x1aa   :  { %v4016_v62 = vpop.f32.mrf.mxu3 }
 0x1ab   :  { %4288 = vmatpush.msra.mxu0 %v4269_v31 }
 0x1ad   :  { %4289 = vmatpush.msra.mxu0 %v4268_v56 }
 0x1af   :  { %4290 = vmatpush.msra.mxu0 %v4267_v37 }
 0x1b1   :  { %4291 = vmatpush.msra.mxu0 %v4266_v40 }
 0x1b3   :  { %4292 = vmatpush.msra.mxu0 %v4265_v42 }
 0x1b9   :  { %v4027_v35 = vpop.f32.mrf.mxu0 }
 0x1ba   :  { %v4028_v36 = vadd.f32 %v4027_v35, %v4015_v60  ;;  %v4040_v29 = vpop.f32.mrf.mxu1 }
 0x1bc   :  { %v4041_v30 = vadd.f32 %v4040_v29, %v4028_v36  ;;  %v4264_v36 = vld [vmem:[#allocation10 + $0x18] sm:$0xff] }
 0x1bd   :  { %4293 = vmatpush.msra.mxu0 %v4264_v36 }
 0x1c1   :  { %v4053_v63 = vpop.f32.mrf.mxu2  ;;  %v4029_v57 = vpop.f32.mrf.mxu0 }
 0x1c2   :  { %v4054_v0 = vadd.f32 %v4053_v63, %v4041_v30  ;;  %v4066_v1 = vpop.f32.mrf.mxu3  ;;  %v4042_v2 = vpop.f32.mrf.mxu1 }
 0x1c4   :  { %v4067_v58 = vadd.f32 %v4066_v1, %v4054_v0  ;;  %v4263_v0 = vld [vmem:[#allocation10 + $0x10] sm:$0xff] }
 0x1c5   :  { %4294 = vmatpush.msra.mxu0 %v4263_v0 }
 0x1c9   :  { %v4055_v3 = vpop.f32.mrf.mxu2 }
 0x1ca   :  { %v4068_v4 = vpop.f32.mrf.mxu3 }
 0x1cb   :  { %v4261_v4 = vld [vmem:[#allocation10] sm:$0xff] }
 0x1d9   :  { %v4079_v5 = vpop.f32.mrf.mxu0 }
 0x1da   :  { %v4092_v6 = vpop.f32.mrf.mxu1  ;;  %v4080_v16 = vadd.f32 %v4079_v5, %v4067_v58  ;;  %v4262_v58 = vld [vmem:[#allocation10 + $0x8] sm:$0xff] }
 0x1db   :  { %4295 = vmatpush.msra.mxu0 %v4262_v58 }
 0x1dc   :  { %v4093_v20 = vadd.f32 %v4092_v6, %v4080_v16 }
 0x1dd   :  { %4296 = vmatpush.msra.mxu0 %v4261_v4 }
 0x1e1   :  { %v4105_v7 = vpop.f32.mrf.mxu2  ;;  %v4081_v9 = vpop.f32.mrf.mxu0 }
 0x1e2   :  { %v4118_v8 = vpop.f32.mrf.mxu3  ;;  %v4094_v10 = vpop.f32.mrf.mxu1  ;;  %v4106_v21 = vadd.f32 %v4105_v7, %v4093_v20 }
 0x1e4   :  { %v4119_v24 = vadd.f32 %v4118_v8, %v4106_v21 }
 0x1e9   :  { %v4107_v11 = vpop.f32.mrf.mxu2 }
 0x1ea   :  { %v4120_v12 = vpop.f32.mrf.mxu3 }
 0x1f9   :  { %v4131_v13 = vpop.f32.mrf.mxu0 }
 0x1fa   :  { %v4144_v14 = vpop.f32.mrf.mxu1  ;;  %v4132_v26 = vadd.f32 %v4131_v13, %v4119_v24  ;;  %v6282_v24 = vld [vmem:[#allocation11] ss:$0 sm:$0xff] }
 0x1fc   :  { %v4145_v27 = vadd.f32 %v4144_v14, %v4132_v26 }
 0x201   :  { %v4157_v15 = vpop.f32.mrf.mxu2  ;;  %v4133_v18 = vpop.f32.mrf.mxu0 }
 0x202   :  { %v4170_v17 = vpop.f32.mrf.mxu3  ;;  %v4146_v19 = vpop.f32.mrf.mxu1  ;;  %v4158_v32 = vadd.f32 %v4157_v15, %v4145_v27 }
 0x204   :  { %v4171_v46 = vadd.f32 %v4170_v17, %v4158_v32 }
 0x209   :  { %v4159_v22 = vpop.f32.mrf.mxu2 }
 0x20a   :  { %v4172_v23 = vpop.f32.mrf.mxu3 }
 0x219   :  { %v4183_v47 = vpop.f32.mrf.mxu0 }
 0x21a   :  { %v4196_v48 = vpop.f32.mrf.mxu1  ;;  %v4184_v50 = vadd.f32 %v4183_v47, %v4171_v46 }
 0x21c   :  { %v4197_v25 = vadd.f32 %v4196_v48, %v4184_v50 }
 0x221   :  { %v4209_v53 = vpop.f32.mrf.mxu2  ;;  %v4185_v44 = vpop.f32.mrf.mxu0 }
 0x222   :  { %v4222_v54 = vpop.f32.mrf.mxu3  ;;  %v4210_v43 = vadd.f32 %v4209_v53, %v4197_v25  ;;  %v4198_v55 = vpop.f32.mrf.mxu1 }
 0x224   :  { %v4223_v33 = vadd.f32 %v4222_v54, %v4210_v43 }
 0x226   :  { %vm4226_vm10 = vcmp.gt.f32.partialorder %v4223_v33, 0.0  ;;  %v4227_v59 = vmul.f32 0.2, %v4223_v33 }
 0x228   :  { %v4228_v38 = vsel %vm4226_vm10, %v4223_v33, %v4227_v59 }
 0x229   :  { %v4229_v60 = vsel %vm115_vm0, %v4228_v38, 0.0  ;;  %v4236_v61 = vmul.f32 %v4228_v38, %v4228_v38  ;;  %v4211_v41 = vpop.f32.mrf.mxu2 }
 0x22a   :  { %v4224_v62 = vpop.f32.mrf.mxu3  ;;  %v4230_v35 = vrot.slane %v4229_v60, 4 }
 0x22b   :  { %v4237_v29 = vsel %vm115_vm0, %v4236_v61, 0.0 }
 0x22c   :  { %v4231_v30 = vadd.f32 %v4230_v35, %v4229_v60  ;;  %v4238_v63 = vrot.slane %v4237_v29, 4 }
 0x22e   :  { %v4232_v1 = vrot.slane %v4231_v30, 2  ;;  %v4239_v57 = vadd.f32 %v4238_v63, %v4237_v29 }
 0x230   :  { %v4233_v2 = vadd.f32 %v4232_v1, %v4231_v30  ;;  %v4240_v3 = vrot.slane %v4239_v57, 2 }
 0x232   :  { %v4234_v5 = vrot.slane %v4233_v2, 1  ;;  %v4241_v6 = vadd.f32 %v4240_v3, %v4239_v57 }
 0x234   :  { %v4235_v7 = vadd.f32 %v4234_v5, %v4233_v2  ;;  %v4242_v8 = vrot.slane %v4241_v6, 1 }
 0x236   :  { %v4243_v9 = vadd.f32 %v4242_v8, %v4241_v6  ;;  %v4244_v10 = vmul.f32 0.25, %v4235_v7 }
 0x238   :  { %v4245_v11 = vmul.f32 0.25, %v4243_v9  ;;  %v4246_v12 = vmul.f32 %v4244_v10, %v4244_v10  ;;  %v4248_v21 = vsub.f32 %v4228_v38, %v4244_v10 }
 0x23a   :  { %v4247_v13 = vsub.f32 %v4245_v11, %v4246_v12 }
 0x23c   :  { %v4249_v14 = vadd.f32 1e-05, %v4247_v13 }
 0x23e   :  { %6283 = vrsqrt.f32 %v4249_v14  ;;  %vm4256_vm11 = vweird.f32 %v4249_v14 }
 0x244   :  { %v6284_v15 = vpop.eup %6283 }
 0x245   :  { %v4251_v16 = vmul.f32 %v6284_v15, %v4249_v14  ;;  %vm4257_vm0 = vweird.f32 %v6284_v15 }
 0x246   :  { %vm4258_vm12 = vmor %vm4256_vm11, %vm4257_vm0 }
 0x247   :  { %v4252_v17 = vmul.f32 %v6284_v15, %v4251_v16 }
 0x249   :  { %v4253_v18 = vmul.f32 0.5, %v4252_v17 }
 0x24b   :  { %v4254_v19 = vsub.f32 1.5, %v4253_v18 }
 0x24d   :  { %v4255_v20 = vmul.f32 %v6284_v15, %v4254_v19 }
 0x24f   :  { %v4259_v22 = vsel %vm4258_vm12, %v6284_v15, %v4255_v20 }
 0x250   :  { %v4260_v23 = vmul.f32 %v4259_v22, %v4248_v21 }
 0x252   :  { %4297 = vmatmul.f32.vlgmr.msra.gmra.mxu0 %v4260_v23 }
 0x2cf   :  { %v4298_v26 = vpop.f32.mrf.mxu0 }
 0x2d0   :  { %v4299_v34 = vadd.f32 %v6282_v24, %v4298_v26 }
 0x2d2   :  { %vm4301_vm13 = vcmp.gt.f32.partialorder %v4299_v34, 0.0  ;;  %v4302_v27 = vmul.f32 0.2, %v4299_v34 }
 0x2d4   :  { %v4303_v28 = vsel %vm4301_vm13, %v4299_v34, %v4302_v27 }
 0x2d5   :  { %4304 = vst [vmem:[#allocation13] sm:$0xf] %v4303_v28 }
 0x2d6   :  { %4315 = dma.vmem_to_hbm [thread:$0]  %s4311_s5, 64, %s4313_s29, [#allocation4]  }
 0x2d7   :  { %6461 = dma.done.wait [#allocation4], 64  }
 0x2d8   :  { %6462 = vsyncadd [#allocation4], 4294967232 }
 0x2d9   :  { %4320 = vsyncpa [#allocation3], 1 }
 0x2da   :  { %4321 = vsyncpa [#allocation6], 1 }
 0x2db   :  { %4322 = vsyncpa [#allocation9], 1 }
 0x2dc   :  { %4323 = vsyncpa [#allocation12], 1 }
 0x2dd   :  { %4324 = vsyncpa [#allocation4], 1 }

</bundles_post_ra>
